<compile_context>
chip_gen: v5e
topology: v5e:2x2
jax: 0.10.0
libtpu: 0.0.40
codegen_flags: <defaults>
</compile_context>

<pallas_src>
import math

import jax
import jax.numpy as jnp
from jax import lax
from jax.experimental import pallas as pl
from jax.experimental.pallas import tpu as pltpu

block_size = 32   # max sequence length (causal mask size)
n_embd = 64       # embedding dim C
head_size = 16    # H


def _head_kernel(x_ref, wqkv_ref, o_ref):
    # x_ref   : (Bb, T, C)  block of Bb batch elements (f32, or bf16 on v6e/v7x)
    # wqkv_ref: (C, 3H)     fused [query | key | value] weights (query pre-scaled)
    # o_ref   : (Bb, T, H)  output block (f32)
    Bb, T, C = x_ref.shape
    H = o_ref.shape[-1]
    mm_dtype = x_ref.dtype                         # matmul-operand dtype (bf16 on v6e/v7x)

    x2d = x_ref[...].reshape(Bb * T, C)            # leading-dim collapse (layout-preserving)
    wqkv = wqkv_ref[...]                           # (C, 3H)

    # Fused QKV projection: one MXU matmul, M = Bb*T rows, N = 3H lanes, f32 accumulation.
    qkv = jnp.dot(x2d, wqkv, preferred_element_type=jnp.float32)   # (Bb*T, 3H) f32
    qkv = qkv.reshape(Bb, T, 3 * H)
    q = qkv[:, :, 0 * H:1 * H]                     # C**-0.5 scale already folded into weights
    k = qkv[:, :, 1 * H:2 * H]
    v = qkv[:, :, 2 * H:3 * H]

    # Attention scores: batched contraction over H, no explicit transpose.
    wei = jnp.einsum('btd,bsd->bts', q.astype(mm_dtype), k.astype(mm_dtype),
                     preferred_element_type=jnp.float32)           # (Bb, T, T) f32

    # Causal (tril) mask built once at (1, T, T) and broadcast over the batch block.
    # Large finite negative instead of -inf: exp underflows to exactly 0, NaN-safe.
    row = lax.broadcasted_iota(jnp.int32, (1, T, T), 1)
    col = lax.broadcasted_iota(jnp.int32, (1, T, T), 2)
    wei = jnp.where(col <= row, wei, -1e30)

    # Numerically stable softmax in f32; reciprocal on the EUP (approx) + one Newton
    # refinement step so numerics stay f32-exact.
    m = jnp.max(wei, axis=-1, keepdims=True)
    e = jnp.exp(wei - m)
    s = jnp.sum(e, axis=-1, keepdims=True)
    r = pl.reciprocal(s, approx=True)
    r = r * (2.0 - s * r)
    p = e * r

    # TODO(synk): nn.Dropout(0.1) is identity in eval/inference mode; training-mode
    # stochastic dropout (pltpu.prng_*) is intentionally omitted.

    out = jnp.einsum('bts,bsd->btd', p.astype(mm_dtype), v.astype(mm_dtype),
                     preferred_element_type=jnp.float32)           # (Bb, T, H) f32
    o_ref[...] = out.astype(o_ref.dtype)


def _device_kind():
    try:
        return jax.devices()[0].device_kind.lower()
    except Exception:
        return ""


def _plan_batch_blocking(B, T, C, H, in_itemsize, out_itemsize, two_tensorcores):
    """Choose (grid_steps, Bb, padded_B).

    Single-TC chips: one grid step (whole batch).  v7x: 2 steps to use both TCs.
    Bb is capped so 2x(x block) + 2x(out block) + weights stays well under the
    scoped-VMEM default; prime / indivisible B is handled by padding, never Bb=1 loops.
    """
    per_batch = 2 * T * C * in_itemsize + 2 * T * H * out_itemsize   # double-buffered blocks
    budget = 24 << 20                                                # headroom under 32 MiB scoped
    max_bb = max(1, budget // max(per_batch, 1))
    steps = 2 if (two_tensorcores and B >= 2) else 1
    steps = max(steps, -(-B // max_bb))          # enough steps to fit the VMEM budget
    bb = -(-B // steps)                          # ceil-divide; pad B instead of degrading Bb
    return steps, bb, steps * bb


def head_forward(x, w_key, w_query, w_value):
    """x: (B, T, C) float32; w_*: (C, H) float32.  Returns (B, T, H) float32."""
    B, T, C = x.shape
    H = w_key.shape[1]
    assert T <= block_size and C == n_embd

    kind = _device_kind()
    is_v7x = "v7" in kind
    use_bf16 = ("v6" in kind) or is_v7x          # bf16-native MXU; halves x DMA bytes

    out_dtype = x.dtype

    # Fuse weights -> single DMA + single matmul.  Fold the C**-0.5 softmax scale into
    # the query columns (free at wrapper time), and put query first so the scores-matmul
    # operand slice starts at lane 0.
    w_qkv = jnp.concatenate([w_query * (C ** -0.5), w_key, w_value], axis=1)   # (C, 3H)

    mm_dtype = jnp.bfloat16 if use_bf16 else x.dtype
    x_in = x.astype(mm_dtype)
    w_qkv = w_qkv.astype(mm_dtype)

    steps, Bb, Bp = _plan_batch_blocking(
        B, T, C, H,
        jnp.dtype(mm_dtype).itemsize, jnp.dtype(out_dtype).itemsize,
        two_tensorcores=is_v7x)
    if Bp != B:
        x_in = jnp.pad(x_in, ((0, Bp - B), (0, 0), (0, 0)))

    out = pl.pallas_call(
        _head_kernel,
        out_shape=jax.ShapeDtypeStruct((Bp, T, H), out_dtype),
        grid_spec=pltpu.PrefetchScalarGridSpec(
            num_scalar_prefetch=0,
            grid=(steps,),
            in_specs=[
                pl.BlockSpec((Bb, T, C), lambda b: (b, 0, 0)),   # x: Bb batch elements/step
                pl.BlockSpec((C, 3 * H), lambda b: (0, 0)),      # fused [q|k|v] weights (resident)
            ],
            out_specs=pl.BlockSpec((Bb, T, H), lambda b: (b, 0, 0)),
        ),
        compiler_params=pltpu.CompilerParams(
            dimension_semantics=("parallel",),   # batch-block axis shards across TCs (v7x)
        ),
    )(x_in, w_qkv)

    return out[:B] if Bp != B else out


def _reference(x, w_key, w_query, w_value):
    """Pure-JAX f32 reference matching the PyTorch forward (eval mode)."""
    B, T, C = x.shape
    k = x @ w_key
    q = x @ w_query
    v = x @ w_value
    wei = (q @ jnp.swapaxes(k, -2, -1)) * (C ** -0.5)
    tril = jnp.tril(jnp.ones((T, T), dtype=bool))
    wei = jnp.where(tril, wei, -jnp.inf)
    wei = jax.nn.softmax(wei, axis=-1)
    return wei @ v


if __name__ == "__main__":
    key = jax.random.PRNGKey(0)
    k_x, k_k, k_q, k_v = jax.random.split(key, 4)

    B, T, C, H = 8, block_size, n_embd, head_size

    x = jax.random.normal(k_x, (B, T, C), dtype=jnp.float32)

    # Deterministic weight init (mimics nn.Linear uniform(-1/sqrt(C), 1/sqrt(C))).
    bound = 1.0 / math.sqrt(C)
    w_key = jax.random.uniform(k_k, (C, H), jnp.float32, -bound, bound)
    w_query = jax.random.uniform(k_q, (C, H), jnp.float32, -bound, bound)
    w_value = jax.random.uniform(k_v, (C, H), jnp.float32, -bound, bound)

    out = head_forward(x, w_key, w_query, w_value)
    out = jax.block_until_ready(out)

    ref = _reference(x, w_key, w_query, w_value)
    assert out.shape == (B, T, H)

    kind = _device_kind()
    tol = 2e-2 if (("v6" in kind) or ("v7" in kind)) else 1e-4   # bf16 MXU operands on v6e/v7x
    assert jnp.allclose(out, ref, atol=tol, rtol=tol), "mismatch vs reference"

    print("KERNEL_OK")
</pallas_src>

<mosaic_0001>
module attributes {stable_mosaic.version = 11 : i64} {
  func.func @_head_kernel(%arg0: i32, %arg1: memref<8x32x64xf32, #tpu.memory_space<vmem>>, %arg2: memref<64x48xf32, #tpu.memory_space<vmem>>, %arg3: memref<8x32x16xf32, #tpu.memory_space<vmem>>) attributes {dimension_semantics = [#tpu.dimension_semantics<parallel>], iteration_bounds = array<i64: 1>, scalar_prefetch = 0 : i64, scratch_operands = 0 : i64, tpu.core_type = #tpu.core_type<tc>, window_params = [{transform_indices = @transform_0, window_bounds = array<i64: 8, 32, 64>}, {pipeline_mode = #tpu.pipeline_mode<synchronous>, transform_indices = @transform_1, window_bounds = array<i64: 64, 48>}, {transform_indices = @transform_2, window_bounds = array<i64: 8, 32, 16>}]} {
    %c0 = arith.constant 0 : index
    %c0_0 = arith.constant 0 : index
    %c0_1 = arith.constant 0 : index
    %0 = vector.load %arg1[%c0, %c0_0, %c0_1] : memref<8x32x64xf32, #tpu.memory_space<vmem>>, vector<8x32x64xf32>
    %1 = vector.shape_cast %0 : vector<8x32x64xf32> to vector<256x64xf32>
    %c0_2 = arith.constant 0 : index
    %c0_3 = arith.constant 0 : index
    %2 = vector.load %arg2[%c0_2, %c0_3] : memref<64x48xf32, #tpu.memory_space<vmem>>, vector<64x48xf32>
    %cst = arith.constant dense<0.000000e+00> : vector<256x48xf32>
    %3 = tpu.matmul %1, %2, %cst {dimension_numbers = #tpu.dot_dimension_numbers<[1], [0], [0], [1], [0, 0, 1, 1], [], []>} : vector<256x64xf32>, vector<64x48xf32>, vector<256x48xf32> -> vector<256x48xf32>
    %4 = vector.shape_cast %3 : vector<256x48xf32> to vector<8x32x48xf32>
    %5 = vector.extract_strided_slice %4 {offsets = [0, 0, 0], sizes = [8, 32, 16], strides = [1, 1, 1]} : vector<8x32x48xf32> to vector<8x32x16xf32>
    %6 = vector.extract_strided_slice %4 {offsets = [0, 0, 16], sizes = [8, 32, 16], strides = [1, 1, 1]} : vector<8x32x48xf32> to vector<8x32x16xf32>
    %7 = vector.extract_strided_slice %4 {offsets = [0, 0, 32], sizes = [8, 32, 16], strides = [1, 1, 1]} : vector<8x32x48xf32> to vector<8x32x16xf32>
    "tpu.trace_start"() <{level = 10 : i32, message = "btd,bsd->bts"}> : () -> ()
    %cst_4 = arith.constant dense<0.000000e+00> : vector<8x32x32xf32>
    %8 = tpu.matmul %5, %6, %cst_4 {dimension_numbers = #tpu.dot_dimension_numbers<[2], [2], [1], [1], [0, 0, 0, 1, 1, 1], [0], [0]>} : vector<8x32x16xf32>, vector<8x32x16xf32>, vector<8x32x32xf32> -> vector<8x32x32xf32>
    "tpu.trace_stop"() : () -> ()
    %9 = tpu.iota {dimensions = array<i32: 1>} : vector<1x32x32xi32>
    %10 = tpu.iota {dimensions = array<i32: 2>} : vector<1x32x32xi32>
    %11 = arith.cmpi sle, %10, %9 : vector<1x32x32xi32>
    %cst_5 = arith.constant -1.000000e+30 : f32
    %12 = vector.shape_cast %11 : vector<1x32x32xi1> to vector<1x32x32xi1>
    %13 = vector.broadcast %12 : vector<1x32x32xi1> to vector<8x32x32xi1>
    %14 = vector.broadcast %cst_5 : f32 to vector<8x32x32xf32>
    %15 = arith.select %13, %8, %14 : vector<8x32x32xi1>, vector<8x32x32xf32>
    %cst_6 = arith.constant dense<0xFF800000> : vector<8x32xf32>
    %16 = vector.multi_reduction <maximumf>, %15, %cst_6 [2] : vector<8x32x32xf32> to vector<8x32xf32>
    %17 = vector.shape_cast %16 : vector<8x32xf32> to vector<8x32x1xf32>
    %18 = vector.broadcast %17 : vector<8x32x1xf32> to vector<8x32x32xf32>
    %19 = arith.subf %15, %18 : vector<8x32x32xf32>
    %20 = math.exp %19 : vector<8x32x32xf32>
    %cst_7 = arith.constant dense<0.000000e+00> : vector<8x32xf32>
    %21 = vector.multi_reduction <add>, %20, %cst_7 [2] : vector<8x32x32xf32> to vector<8x32xf32>
    %22 = vector.shape_cast %21 : vector<8x32xf32> to vector<8x32x1xf32>
    %23 = tpu.reciprocal %22 {approx = true} : vector<8x32x1xf32> -> vector<8x32x1xf32>
    %24 = arith.mulf %22, %23 : vector<8x32x1xf32>
    %cst_8 = arith.constant 2.000000e+00 : f32
    %25 = vector.broadcast %cst_8 : f32 to vector<8x32x1xf32>
    %26 = arith.subf %25, %24 : vector<8x32x1xf32>
    %27 = arith.mulf %23, %26 : vector<8x32x1xf32>
    %28 = vector.broadcast %27 : vector<8x32x1xf32> to vector<8x32x32xf32>
    %29 = arith.mulf %20, %28 : vector<8x32x32xf32>
    "tpu.trace_start"() <{level = 10 : i32, message = "bts,bsd->btd"}> : () -> ()
    %cst_9 = arith.constant dense<0.000000e+00> : vector<8x32x16xf32>
    %30 = tpu.matmul %29, %7, %cst_9 {dimension_numbers = #tpu.dot_dimension_numbers<[2], [1], [1], [2], [0, 0, 0, 1, 1, 2], [0], [0]>} : vector<8x32x32xf32>, vector<8x32x16xf32>, vector<8x32x16xf32> -> vector<8x32x16xf32>
    "tpu.trace_stop"() : () -> ()
    %c0_10 = arith.constant 0 : index
    %c0_11 = arith.constant 0 : index
    %c0_12 = arith.constant 0 : index
    %31 = vector.load %arg3[%c0_10, %c0_11, %c0_12] : memref<8x32x16xf32, #tpu.memory_space<vmem>>, vector<8x32x16xf32>
    tpu.vector_store %arg3[%c0_10, %c0_11, %c0_12], %30 {strides = array<i32>} : memref<8x32x16xf32, #tpu.memory_space<vmem>>, vector<8x32x16xf32>,
    return
  }
  func.func @transform_0(%arg0: i32) -> (i32, i32, i32) {
    %c0_i32 = arith.constant 0 : i32
    %c0_i32_0 = arith.constant 0 : i32
    %c0_i32_1 = arith.constant 0 : i32
    return %arg0, %c0_i32, %c0_i32_0 : i32, i32, i32
  }
  func.func @transform_1(%arg0: i32) -> (i32, i32) {
    %c0_i32 = arith.constant 0 : i32
    %c0_i32_0 = arith.constant 0 : i32
    %c0_i32_1 = arith.constant 0 : i32
    return %c0_i32, %c0_i32_0 : i32, i32
  }
  func.func @transform_2(%arg0: i32) -> (i32, i32, i32) {
    %c0_i32 = arith.constant 0 : i32
    %c0_i32_0 = arith.constant 0 : i32
    %c0_i32_1 = arith.constant 0 : i32
    return %arg0, %c0_i32, %c0_i32_0 : i32, i32, i32
  }
}

</mosaic_0001>

<bundles_post_ra>
// kernel: tpu_custom_call.1
= control target key start
LH: loop header
LB: loop body
LE: loop exit
PB: predicated region body
PF: predicated region fallthrough
CT: control target
= control target key end

     0   :  { %7 = vsyncpa [#allocation3], 0  ;;  %s2078_s12 = smov [#allocation2]   ;;  %s2079_s14 = smov 128   ;;  %s3028_s0 = inlined_call_operand.hbm [shape: f32[8,32,64], index: 0, kind: input, shape index: {}]   ;;  %s3029_s1 = inlined_call_operand.vmem [shape: f32[64,48], index: 1, kind: input, shape index: {}]   ;;  %s3030_s2 = inlined_call_operand.vmem [shape: f32[8,32,16], index: 2, kind: output, shape index: {}]  }
   0x1   :  { %s12_s11 = sshll.u32 %s3028_s0, 4  ;;  %s14_s13 = sshll.u32 %s2078_s12, 4  ;;  %s13_s11 = int_to_ptr.hbm [resolvable:$true] %s12_s11  ;;  %s15_s13 = int_to_ptr.vmem [resolvable:$true] %s14_s13 }
   0x2   :  { %s2080_s15 = smov 8  }
   0x3   :  { %20 = dma.hbm_to_vmem [thread:$0]  %s13_s11, 4096, %s15_s13, [#allocation3], %s2079_s14, %s2079_s14, %s2080_s15  }
   0x4   :  { %2076 = dma.done.wait [#allocation3], 4096  }
   0x5   :  { %2077 = vsyncadd [#allocation3], 4294963200  ;;  %v66_v0 = vld [vmem:[%s3029_s1 + $0x38] sm:$0xff]  ;;  %v65_v1 = vld [vmem:[%s3029_s1 + $0x30] sm:$0xff]  ;;  %vm67_vm0 = vcmask 523264   ;;  %s2082_s3 = smov 96  }
   0x6   :  { %172 = vmatpush.msra.mxu0 %v66_v0  ;;  %1824 = vmatpush.msra.mxu3 %v66_v0  ;;  %v64_v2 = vld [vmem:[%s3029_s1 + $0x28] sm:$0xff]  ;;  %v63_v3 = vld [vmem:[%s3029_s1 + $0x20] sm:$0xff]  ;;  %v62_v4 = vld [vmem:[%s3029_s1 + $0x18] sm:$0xff]  ;;  %vm289_vm1 = vcmask 130048   ;;  %vm785_vm3 = vcmask 261120  }
   0x7   :  { %1823 = vmatpush.msra.mxu2 %v66_v0  ;;  %v61_v5 = vld [vmem:[%s3029_s1 + $0x10] sm:$0xff]  ;;  %v60_v6 = vld [vmem:[%s3029_s1 + $0x8] sm:$0xff]  ;;  %v59_v7 = vld [vmem:[%s3029_s1] sm:$0xff]  ;;  %s2081_s1 = smov 112  }
   0x8   :  { %173 = vmatpush.msra.mxu0 %v65_v1  ;;  %1826 = vmatpush.msra.mxu3 %v65_v1  ;;  %v27_v8 = vld [vmem:[#allocation2] sm:$0xff]  ;;  %v28_v9 = vld [vmem:[#allocation2 + $0x8] sm:$0xff]  ;;  %v29_v10 = vld [vmem:[#allocation2 + $0x10] sm:$0xff] }
   0x9   :  { %1825 = vmatpush.msra.mxu2 %v65_v1  ;;  %v30_v11 = vld [vmem:[#allocation2 + $0x18] sm:$0xff]  ;;  %v31_v12 = vld [vmem:[#allocation2 + $0x20] sm:$0xff]  ;;  %v32_v13 = vld [vmem:[#allocation2 + $0x28] sm:$0xff] }
   0xa   :  { %174 = vmatpush.msra.mxu0 %v64_v2  ;;  %1828 = vmatpush.msra.mxu3 %v64_v2  ;;  %v33_v14 = vld [vmem:[#allocation2 + $0x30] sm:$0xff]  ;;  %v55_v15 = vld [vmem:[#allocation2 + $0xe0] sm:$0xff]  ;;  %v34_v16 = vld [vmem:[#allocation2 + $0x38] sm:$0xff] }
   0xb   :  { %1827 = vmatpush.msra.mxu2 %v64_v2  ;;  %v56_v17 = vld [vmem:[#allocation2 + $0xe8] sm:$0xff]  ;;  %v35_v18 = vld [vmem:[#allocation2 + $0x40] sm:$0xff]  ;;  %v57_v20 = vld [vmem:[#allocation2 + $0xf0] sm:$0xff] }
   0xc   :  { %175 = vmatpush.msra.mxu0 %v63_v3  ;;  %1830 = vmatpush.msra.mxu3 %v63_v3  ;;  %v51_v19 = vld [vmem:[#allocation2 + $0xc0] sm:$0xff]  ;;  %v36_v21 = vld [vmem:[#allocation2 + $0x48] sm:$0xff]  ;;  %v58_v22 = vld [vmem:[#allocation2 + $0xf8] sm:$0xff] }
   0xd   :  { %1829 = vmatpush.msra.mxu2 %v63_v3  ;;  %v37_v23 = vld [vmem:[#allocation2 + $0x50] sm:$0xff]  ;;  %v38_v24 = vld [vmem:[#allocation2 + $0x58] sm:$0xff]  ;;  %v52_v25 = vld [vmem:[#allocation2 + $0xc8] sm:$0xff] }
   0xe   :  { %176 = vmatpush.msra.mxu0 %v62_v4  ;;  %1832 = vmatpush.msra.mxu3 %v62_v4  ;;  %v39_v26 = vld [vmem:[#allocation2 + $0x60] sm:$0xff]  ;;  %v53_v27 = vld [vmem:[#allocation2 + $0xd0] sm:$0xff]  ;;  %v40_v28 = vld [vmem:[#allocation2 + $0x68] sm:$0xff] }
   0xf   :  { %1831 = vmatpush.msra.mxu2 %v62_v4  ;;  %v54_v29 = vld [vmem:[#allocation2 + $0xd8] sm:$0xff]  ;;  %v41_v30 = vld [vmem:[#allocation2 + $0x70] sm:$0xff]  ;;  %v43_v33 = vld [vmem:[#allocation2 + $0x80] sm:$0xff] }
  0x10   :  { %177 = vmatpush.msra.mxu0 %v61_v5  ;;  %1834 = vmatpush.msra.mxu3 %v61_v5  ;;  %v42_v31 = vld [vmem:[#allocation2 + $0x78] sm:$0xff]  ;;  %v44_v35 = vld [vmem:[#allocation2 + $0x88] sm:$0xff]  ;;  %v45_v37 = vld [vmem:[#allocation2 + $0x90] sm:$0xff] }
  0x11   :  { %1833 = vmatpush.msra.mxu2 %v61_v5  ;;  %v46_v39 = vld [vmem:[#allocation2 + $0x98] sm:$0xff]  ;;  %v47_v41 = vld [vmem:[#allocation2 + $0xa0] sm:$0xff]  ;;  %v48_v43 = vld [vmem:[#allocation2 + $0xa8] sm:$0xff] }
  0x12   :  { %178 = vmatpush.msra.mxu0 %v60_v6  ;;  %1836 = vmatpush.msra.mxu3 %v60_v6  ;;  %v49_v45 = vld [vmem:[#allocation2 + $0xb0] sm:$0xff]  ;;  %v50_v47 = vld [vmem:[#allocation2 + $0xb8] sm:$0xff] }
  0x13   :  { %1835 = vmatpush.msra.mxu2 %v60_v6 }
  0x14   :  { %179 = vmatpush.msra.mxu0 %v59_v7  ;;  %1838 = vmatpush.msra.mxu3 %v59_v7 }
  0x15   :  { %1695 = vmatmul.msk.f32.vlgmr.msra.gmra.mxu0 %vm67_vm0, %v27_v8  ;;  %1837 = vmatpush.msra.mxu2 %v59_v7 }
  0x16   :  { %1723 = vmatmul.msk.f32.vlgmr.msra.gmra.mxu3 %vm67_vm0, %v55_v15  ;;  %1719 = vmatmul.msk.f32.vlgmr.msra.gmra.mxu2 %vm67_vm0, %v51_v19 }
  0x1d   :  { %1696 = vmatmul.msk.f32.gmra.mxu0 %vm67_vm0, %v28_v9 }
  0x1e   :  { %1724 = vmatmul.msk.f32.gmra.mxu3 %vm67_vm0, %v56_v17  ;;  %1720 = vmatmul.msk.f32.gmra.mxu2 %vm67_vm0, %v52_v25 }
  0x25   :  { %1697 = vmatmul.msk.f32.gmra.mxu0 %vm67_vm0, %v29_v10 }
  0x26   :  { %1725 = vmatmul.msk.f32.gmra.mxu3 %vm67_vm0, %v57_v20  ;;  %1721 = vmatmul.msk.f32.gmra.mxu2 %vm67_vm0, %v53_v27 }
  0x2d   :  { %1698 = vmatmul.msk.f32.gmra.mxu0 %vm67_vm0, %v30_v11 }
  0x2e   :  { %1726 = vmatmul.msk.f32.gmra.mxu3 %vm67_vm0, %v58_v22  ;;  %1722 = vmatmul.msk.f32.gmra.mxu2 %vm67_vm0, %v54_v29 }
  0x35   :  { %1699 = vmatmul.msk.f32.gmra.mxu0 %vm67_vm0, %v31_v12 }
  0x3d   :  { %1700 = vmatmul.msk.f32.gmra.mxu0 %vm67_vm0, %v32_v13 }
  0x45   :  { %1701 = vmatmul.msk.f32.gmra.mxu0 %vm67_vm0, %v33_v14 }
  0x4d   :  { %1702 = vmatmul.msk.f32.gmra.mxu0 %vm67_vm0, %v34_v16 }
  0x55   :  { %1703 = vmatmul.msk.f32.gmra.mxu0 %vm67_vm0, %v35_v18 }
  0x5d   :  { %1704 = vmatmul.msk.f32.gmra.mxu0 %vm67_vm0, %v36_v21 }
  0x65   :  { %1705 = vmatmul.msk.f32.gmra.mxu0 %vm67_vm0, %v37_v23 }
  0x6d   :  { %1706 = vmatmul.msk.f32.gmra.mxu0 %vm67_vm0, %v38_v24 }
  0x75   :  { %1707 = vmatmul.msk.f32.gmra.mxu0 %vm67_vm0, %v39_v26 }
  0x7d   :  { %1708 = vmatmul.msk.f32.gmra.mxu0 %vm67_vm0, %v40_v28 }
  0x85   :  { %1709 = vmatmul.msk.f32.gmra.mxu0 %vm67_vm0, %v41_v30 }
  0x8d   :  { %1710 = vmatmul.msk.f32.gmra.mxu0 %vm67_vm0, %v42_v31 }
  0x92   :  { %v2149_v32 = vpop.f32.mrf.mxu0 }
  0x93   :  { %281 = vrot.lane.b32.xlu0 %v2149_v32, %s2081_s1 }
  0x95   :  { %1711 = vmatmul.msk.f32.gmra.mxu0 %vm67_vm0, %v43_v33 }
  0x99   :  { %v2191_v49 = vpop.f32.mrf.mxu3  ;;  %v2219_v57 = vpop.f32.mrf.mxu2 }
  0x9a   :  { %v2154_v34 = vpop.f32.mrf.mxu0 }
  0x9b   :  { %283 = vrot.lane.b32.xlu2 %v2154_v34, %s2081_s1  ;;  %v1849_v17 = vpack.i.bf16 %v2149_v32, %v2154_v34 }
  0x9d   :  { %1712 = vmatmul.msk.f32.gmra.mxu0 %vm67_vm0, %v44_v35 }
  0xa1   :  { %v2199_v51 = vpop.f32.mrf.mxu3  ;;  %v2243_v63 = vpop.f32.mrf.mxu2 }
  0xa2   :  { %v2159_v36 = vpop.f32.mrf.mxu0 }
  0xa3   :  { %285 = vrot.lane.b32.xlu1 %v2159_v36, %s2081_s1 }
  0xa5   :  { %1713 = vmatmul.msk.f32.gmra.mxu0 %vm67_vm0, %v45_v37 }
  0xa9   :  { %v2205_v53 = vpop.f32.mrf.mxu3  ;;  %v2249_v2 = vpop.f32.mrf.mxu2 }
  0xaa   :  { %v2164_v38 = vpop.f32.mrf.mxu0 }
  0xab   :  { %287 = vrot.lane.b32.xlu0 %v2164_v38, %s2081_s1  ;;  %v1844_v10 = vpack.i.bf16 %v2159_v36, %v2164_v38 }
  0xad   :  { %1714 = vmatmul.msk.f32.gmra.mxu0 %vm67_vm0, %v46_v39 }
  0xb1   :  { %v2211_v55 = vpop.f32.mrf.mxu3  ;;  %v2258_v5 = vpop.f32.mrf.mxu2 }
  0xb2   :  { %v2169_v40 = vpop.f32.mrf.mxu0 }
  0xb5   :  { %1715 = vmatmul.msk.f32.gmra.mxu0 %vm67_vm0, %v47_v41 }
  0xba   :  { %v2172_v42 = vpop.f32.mrf.mxu0 }
  0xbb   :  { %341 = vrot.lane.b32.xlu2 %v2172_v42, %s2081_s1  ;;  %v1859_v59 = vpack.i.bf16 %v2169_v40, %v2172_v42 }
  0xbd   :  { %1716 = vmatmul.msk.f32.gmra.mxu0 %vm67_vm0, %v48_v43 }
  0xc2   :  { %v2177_v44 = vpop.f32.mrf.mxu0 }
  0xc3   :  { %343 = vrot.lane.b32.xlu1 %v2177_v44, %s2081_s1 }
  0xc5   :  { %1717 = vmatmul.msk.f32.gmra.mxu0 %vm67_vm0, %v49_v45 }
  0xca   :  { %v2182_v46 = vpop.f32.mrf.mxu0 }
  0xcb   :  { %339 = vrot.lane.b32.xlu1 %v2169_v40, %s2081_s1  ;;  %345 = vrot.lane.b32.xlu0 %v2182_v46, %s2081_s1  ;;  %v1854_v12 = vpack.i.bf16 %v2177_v44, %v2182_v46 }
  0xcd   :  { %1718 = vmatmul.msk.f32.gmra.mxu0 %vm67_vm0, %v50_v47 }
  0xd2   :  { %v2189_v48 = vpop.f32.mrf.mxu0 }
  0xd3   :  { %396 = vrot.lane.b32.xlu0 %v2189_v48, %s2081_s1 }
  0xda   :  { %v2195_v50 = vpop.f32.mrf.mxu0 }
  0xdb   :  { %398 = vrot.lane.b32.xlu0 %v2195_v50, %s2081_s1 }
  0xe2   :  { %v2201_v52 = vpop.f32.mrf.mxu0 }
  0xe3   :  { %400 = vrot.lane.b32.xlu0 %v2201_v52, %s2081_s1 }
  0xea   :  { %v2207_v54 = vpop.f32.mrf.mxu0 }
  0xeb   :  { %402 = vrot.lane.b32.xlu2 %v2207_v54, %s2081_s1 }
  0xf2   :  { %v2213_v56 = vpop.f32.mrf.mxu0 }
  0xf3   :  { %453 = vrot.lane.b32.xlu0 %v2213_v56, %s2081_s1  ;;  %687 = vrot.lane.b32.xlu2 %v2211_v55, %s2081_s1  ;;  %v1879_v27 = vpack.i.bf16 %v2213_v56, %v2189_v48 }
  0xf5   :  { %v284_v8 = vpop.permute.xlu2 %283 }
  0xfa   :  { %v2221_v58 = vpop.f32.mrf.mxu0 }
  0xfb   :  { %624 = vrot.lane.b32.xlu0 %v2219_v57, %s2081_s1  ;;  %685 = vrot.lane.b32.xlu2 %v2205_v53, %s2081_s1  ;;  %v1874_v61 = vpack.i.bf16 %v2221_v58, %v2195_v50 }
 0x102   :  { %v2229_v60 = vpop.f32.mrf.mxu0 }
 0x103   :  { %1860 = vrot.lane.b32.xlu0 %v1859_v59, %s2082_s3  ;;  %457 = vrot.lane.b32.xlu1 %v2229_v60, %s2081_s1  ;;  %v1869_v18 = vpack.i.bf16 %v2229_v60, %v2201_v52 }
 0x104   :  { %683 = vrot.lane.b32.xlu2 %v2199_v51, %s2081_s1 }
 0x105   :  { %v282_v1 = vpop.permute.xlu0 %281 }
 0x10a   :  { %v2238_v62 = vpop.f32.mrf.mxu0 }
 0x10b   :  { %1875 = vrot.lane.b32.xlu0 %v1874_v61, %s2082_s3  ;;  %459 = vrot.lane.b32.xlu1 %v2238_v62, %s2081_s1  ;;  %v1864_v23 = vpack.i.bf16 %v2238_v62, %v2207_v54 }
 0x112   :  { %v2245_v0 = vpop.f32.mrf.mxu0 }
 0x113   :  { %455 = vrot.lane.b32.xlu1 %v2221_v58, %s2081_s1 }
 0x115   :  { %v286_v6 = vpop.permute.xlu1 %285  ;;  %v342_v14 = vpop.permute.xlu2 %341 }
 0x11a   :  { %v2251_v3 = vpop.f32.mrf.mxu0 }
 0x11b   :  { %510 = vrot.lane.b32.xlu1 %v2245_v0, %s2081_s1  ;;  %512 = vrot.lane.b32.xlu2 %v2251_v3, %s2081_s1  ;;  %v1889_v28 = vpack.i.bf16 %v2245_v0, %v2251_v3 }
 0x11d   :  { %v288_v4 = vpop.permute.xlu0 %287 }
 0x11e   :  { %1727 = vmatpush.xpose.msk.msra.mxu1 %vm289_vm1, %v288_v4 }
 0x122   :  { %v2260_v7 = vpop.f32.mrf.mxu0  ;;  %1728 = vmatpush.xpose.msk.msra.mxu1 %vm289_vm1, %v286_v6 }
 0x123   :  { %630 = vrot.lane.b32.xlu1 %v2258_v5, %s2081_s1  ;;  %514 = vrot.lane.b32.xlu2 %v2260_v7, %s2081_s1 }
 0x126   :  { %1729 = vmatpush.xpose.msk.msra.mxu1 %vm289_vm1, %v284_v8 }
 0x12a   :  { %v2268_v9 = vpop.f32.mrf.mxu0  ;;  %1730 = vmatpush.xpose.msk.msra.mxu1 %vm289_vm1, %v282_v1 }
 0x12b   :  { %628 = vrot.lane.b32.xlu1 %v2249_v2, %s2081_s1  ;;  %516 = vrot.lane.b32.xlu2 %v2268_v9, %s2081_s1  ;;  %v1884_v22 = vpack.i.bf16 %v2260_v7, %v2268_v9 }
 0x12d   :  { %1731 = vmatmul.msk.f32.vlgmr.msra.gmra.mxu1 %vm289_vm1, %v2149_v32 }
 0x132   :  { %v2279_v11 = vpop.f32.mrf.mxu0 }
 0x133   :  { %626 = vrot.lane.b32.xlu1 %v2243_v63, %s2081_s1  ;;  %1845 = vrot.lane.b32.xlu2 %v1844_v10, %s2082_s3 }
 0x134   :  { %567 = vrot.lane.b32.xlu0 %v2279_v11, %s2081_s1 }
 0x135   :  { %1732 = vmatmul.msk.f32.gmra.mxu1 %vm289_vm1, %v2154_v34  ;;  %v344_v16 = vpop.permute.xlu1 %343 }
 0x13a   :  { %v2290_v13 = vpop.f32.mrf.mxu0 }
 0x13b   :  { %681 = vrot.lane.b32.xlu1 %v2191_v49, %s2081_s1  ;;  %1855 = vrot.lane.b32.xlu2 %v1854_v12, %s2082_s3  ;;  %v1899_v33 = vpack.i.bf16 %v2243_v63, %v2290_v13 }
 0x13c   :  { %569 = vrot.lane.b32.xlu0 %v2290_v13, %s2081_s1 }
 0x13d   :  { %1733 = vmatmul.msk.f32.gmra.mxu1 %vm289_vm1, %v2159_v36  ;;  %v346_v15 = vpop.permute.xlu0 %345  ;;  %v340_v24 = vpop.permute.xlu1 %339 }
 0x13e   :  { %1735 = vmatpush.xpose.msk.msrb.mxu2 %vm289_vm1, %v346_v15 }
 0x142   :  { %v2304_v19 = vpop.f32.mrf.mxu0  ;;  %1736 = vmatpush.xpose.msk.msrb.mxu2 %vm289_vm1, %v344_v16 }
 0x143   :  { %1850 = vrot.lane.b32.xlu1 %v1849_v17, %s2082_s3  ;;  %1870 = vrot.lane.b32.xlu2 %v1869_v18, %s2082_s3  ;;  %v1894_v29 = vpack.i.bf16 %v2249_v2, %v2304_v19 }
 0x144   :  { %571 = vrot.lane.b32.xlu0 %v2304_v19, %s2081_s1 }
 0x145   :  { %1734 = vmatmul.msk.f32.gmra.mxu1 %vm289_vm1, %v2164_v38  ;;  %v397_v20 = vpop.permute.xlu0 %396  ;;  %v403_v21 = vpop.permute.xlu2 %402 }
 0x146   :  { %1737 = vmatpush.xpose.msk.msrb.mxu2 %vm289_vm1, %v342_v14  ;;  %1743 = vmatpush.xpose.msk.msrb.mxu3 %vm289_vm1, %v403_v21 }
 0x14a   :  { %v2319_v25 = vpop.f32.mrf.mxu0  ;;  %1738 = vmatpush.xpose.msk.msrb.mxu2 %vm289_vm1, %v340_v24 }
 0x14b   :  { %1865 = vrot.lane.b32.xlu1 %v1864_v23, %s2082_s3  ;;  %573 = vrot.lane.b32.xlu2 %v2319_v25, %s2081_s1  ;;  %v1904_v32 = vpack.i.bf16 %v2258_v5, %v2319_v25 }
 0x14c   :  { %1885 = vrot.lane.b32.xlu0 %v1884_v22, %s2082_s3 }
 0x14d   :  { %1739 = vmatmul.msk.f32.vlgmr.msrb.gmra.mxu2 %vm289_vm1, %v2169_v40  ;;  %v399_v26 = vpop.permute.xlu0 %398  ;;  %v688_v31 = vpop.permute.xlu2 %687 }
 0x153   :  { %1890 = vrot.lane.b32.xlu1 %v1889_v28, %s2082_s3  ;;  %1880 = vrot.lane.b32.xlu2 %v1879_v27, %s2082_s3 }
 0x154   :  { %1895 = vrot.lane.b32.xlu0 %v1894_v29, %s2082_s3 }
 0x155   :  { %1740 = vmatmul.msk.f32.gmra.mxu2 %vm289_vm1, %v2172_v42  ;;  %v401_v30 = vpop.permute.xlu0 %400  ;;  %v686_v34 = vpop.permute.xlu2 %685 }
 0x156   :  { %1744 = vmatpush.xpose.msk.msrb.mxu3 %vm289_vm1, %v401_v30 }
 0x15a   :  { %1745 = vmatpush.xpose.msk.msrb.mxu3 %vm289_vm1, %v399_v26 }
 0x15b   :  { %1905 = vrot.lane.b32.xlu2 %v1904_v32, %s2082_s3 }
 0x15c   :  { %1900 = vrot.lane.b32.xlu0 %v1899_v33, %s2082_s3 }
 0x15d   :  { %1741 = vmatmul.msk.f32.gmra.mxu2 %vm289_vm1, %v2177_v44 }
 0x15e   :  { %1746 = vmatpush.xpose.msk.msrb.mxu3 %vm289_vm1, %v397_v20  ;;  %v684_v35 = vpop.permute.xlu2 %683 }
 0x161   :  { %1747 = vmatmul.msk.f32.vlgmr.msrb.gmra.mxu3 %vm289_vm1, %v2189_v48 }
 0x165   :  { %1742 = vmatmul.msk.f32.gmra.mxu2 %vm289_vm1, %v2182_v46  ;;  %v454_v40 = vpop.permute.xlu0 %453 }
 0x169   :  { %1748 = vmatmul.msk.f32.gmra.mxu3 %vm289_vm1, %v2195_v50 }
 0x16d   :  { %v625_v43 = vpop.permute.xlu0 %624 }
 0x171   :  { %1749 = vmatmul.msk.f32.gmra.mxu3 %vm289_vm1, %v2201_v52 }
 0x175   :  { %v458_v36 = vpop.permute.xlu1 %457  ;;  %v513_v37 = vpop.permute.xlu2 %512 }
 0x176   :  { %v1861_v46 = vpop.permute.xlu0 %1860 }
 0x177   :  { %v1862_v12 = vunpack.i.l.bf16 %v1861_v46  ;;  %v1863_v15 = vunpack.i.h.bf16 %v1861_v46 }
 0x179   :  { %1750 = vmatmul.msk.f32.gmra.mxu3 %vm289_vm1, %v2207_v54 }
 0x17d   :  { %v460_v38 = vpop.permute.xlu1 %459  ;;  %v515_v39 = vpop.permute.xlu2 %514 }
 0x17e   :  { %1751 = vmatpush.xpose.msk.msrb.mxu1 %vm289_vm1, %v460_v38  ;;  %v2382_v52 = vpop.permute.xlu0 %1875 }
 0x182   :  { %1752 = vmatpush.xpose.msk.msrb.mxu1 %vm289_vm1, %v458_v36 }
 0x185   :  { %v456_v41 = vpop.permute.xlu1 %455  ;;  %v517_v42 = vpop.permute.xlu2 %516 }
 0x186   :  { %1753 = vmatpush.xpose.msk.msrb.mxu1 %vm289_vm1, %v456_v41  ;;  %1759 = vmatpush.xpose.msk.msra.mxu2 %vm289_vm1, %v517_v42 }
 0x18a   :  { %1754 = vmatpush.xpose.msk.msrb.mxu1 %vm289_vm1, %v454_v40  ;;  %1760 = vmatpush.xpose.msk.msra.mxu2 %vm289_vm1, %v515_v39 }
 0x18d   :  { %1755 = vmatmul.msk.f32.vlgmr.msrb.gmra.mxu1 %vm289_vm1, %v2213_v56  ;;  %v511_v44 = vpop.permute.xlu1 %510  ;;  %v2368_v45 = vpop.permute.xlu2 %1845  ;;  %v734_v56 = vlaneseq }
 0x18e   :  { %1761 = vmatpush.xpose.msk.msra.mxu2 %vm289_vm1, %v513_v37  ;;  %v1847_v30 = vunpack.i.l.bf16 %v2368_v45  ;;  %v1877_v37 = vunpack.i.l.bf16 %v2382_v52 }
 0x18f   :  { %v740_v59 = vand.u32 127, %v734_v56 }
 0x192   :  { %1762 = vmatpush.xpose.msk.msra.mxu2 %vm289_vm1, %v511_v44 }
 0x195   :  { %1756 = vmatmul.msk.f32.gmra.mxu1 %vm289_vm1, %v2221_v58  ;;  %v631_v47 = vpop.permute.xlu1 %630  ;;  %1763 = vmatmul.msk.f32.vlgmr.msra.gmra.mxu2 %vm289_vm1, %v2245_v0  ;;  %v1856_v48 = vpop.permute.xlu2 %1855  ;;  %v735_v58 = vshrl.u32 %v734_v56, 7 }
 0x196   :  { %1783 = vmatpush.xpose.msk.msrb.mxu2 %vm289_vm1, %v688_v31  ;;  %1775 = vmatpush.xpose.msk.msra.mxu1 %vm289_vm1, %v631_v47  ;;  %v1858_v6 = vunpack.i.h.bf16 %v1856_v48 }
 0x197   :  { %vm2395_vm2 = vcmp.le.s32.totalorder %v740_v59, %v735_v58  ;;  %v736_v8 = vadd.s32 8, %v735_v58  ;;  %v738_v28 = vadd.s32 24, %v735_v58 }
 0x199   :  { %vm2411_vm4 = vcmp.le.s32.totalorder %v740_v59, %v736_v8  ;;  %vm2444_vm6 = vcmp.le.s32.totalorder %v740_v59, %v738_v28 }
 0x19a   :  { %1784 = vmatpush.xpose.msk.msrb.mxu2 %vm289_vm1, %v686_v34 }
 0x19d   :  { %1757 = vmatmul.msk.f32.gmra.mxu1 %vm289_vm1, %v2229_v60  ;;  %v629_v50 = vpop.permute.xlu1 %628  ;;  %1764 = vmatmul.msk.f32.gmra.mxu2 %vm289_vm1, %v2251_v3  ;;  %v2386_v54 = vpop.permute.xlu2 %1870  ;;  %v1857_v3 = vunpack.i.l.bf16 %v1856_v48 }
 0x19e   :  { %1785 = vmatpush.xpose.msk.msrb.mxu2 %vm289_vm1, %v684_v35  ;;  %1776 = vmatpush.xpose.msk.msra.mxu1 %vm289_vm1, %v629_v50  ;;  %v1872_v34 = vunpack.i.l.bf16 %v2386_v54 }
 0x1a5   :  { %1758 = vmatmul.msk.f32.gmra.mxu1 %vm289_vm1, %v2238_v62  ;;  %v627_v61 = vpop.permute.xlu1 %626  ;;  %1765 = vmatmul.msk.f32.gmra.mxu2 %vm289_vm1, %v2260_v7  ;;  %v574_v0 = vpop.permute.xlu2 %573 }
 0x1a6   :  { %v568_v60 = vpop.permute.xlu0 %567  ;;  %1777 = vmatpush.xpose.msk.msra.mxu1 %vm289_vm1, %v627_v61  ;;  %1767 = vmatpush.xpose.msk.msra.mxu3 %vm289_vm1, %v574_v0 }
 0x1aa   :  { %v323_v4 = vpop.f32.mrf.mxu1  ;;  %1778 = vmatpush.xpose.msk.msra.mxu1 %vm289_vm1, %v625_v43 }
 0x1ab   :  { %v2402_v62 = vsel %vm2395_vm2, %v323_v4, -1e+30 }
 0x1ac   :  { %v786_v7 = vsel %vm785_vm3, %v2402_v62, -inf }
 0x1ad   :  { %1779 = vmatmul.msk.f32.vlgmr.msra.gmra.mxu1 %vm289_vm1, %v2219_v57  ;;  %v682_v10 = vpop.permute.xlu1 %681  ;;  %787 = vmax.xlane.f32.xlu2 %v786_v7  ;;  %v1881_v24 = vpop.permute.xlu2 %1880 }
 0x1ae   :  { %1323 = vmatpush.msrb.mxu1 %v1857_v3  ;;  %1766 = vmatmul.msk.f32.gmra.mxu2 %vm289_vm1, %v2268_v9  ;;  %v570_v14 = vpop.permute.xlu0 %569  ;;  %v737_v9 = vadd.s32 16, %v735_v58  ;;  %v1882_v43 = vunpack.i.l.bf16 %v1881_v24  ;;  %v1873_v58 = vunpack.i.h.bf16 %v2386_v54  ;;  %v1883_v61 = vunpack.i.h.bf16 %v1881_v24 }
 0x1af   :  { %1786 = vmatpush.xpose.msk.msrb.mxu2 %vm289_vm1, %v682_v10 }
 0x1b0   :  { %1324 = vmatpush.msrb.mxu1 %v1858_v6  ;;  %vm2426_vm5 = vcmp.le.s32.totalorder %v740_v59, %v737_v9  ;;  %v1878_v59 = vunpack.i.h.bf16 %v2382_v52 }
 0x1b2   :  { %1325 = vmatpush.msrb.mxu1 %v1862_v12  ;;  %v326_v17 = vpop.f32.mrf.mxu1 }
 0x1b3   :  { %v2417_v18 = vsel %vm2411_vm4, %v326_v17, -1e+30 }
 0x1b4   :  { %1326 = vmatpush.msrb.mxu1 %v1863_v15  ;;  %v789_v20 = vsel %vm785_vm3, %v2417_v18, -inf }
 0x1b5   :  { %1780 = vmatmul.msk.f32.gmra.mxu1 %vm289_vm1, %v2243_v63  ;;  %v1851_v21 = vpop.permute.xlu1 %1850  ;;  %790 = vmax.xlane.f32.xlu1 %v789_v20  ;;  %v2452_v40 = vpop.permute.xlu2 %1905 }
 0x1b6   :  { %1787 = vmatmul.msk.f32.vlgmr.msrb.gmra.mxu2 %vm289_vm1, %v2191_v49  ;;  %v572_v22 = vpop.permute.xlu0 %571  ;;  %v1852_v39 = vunpack.i.l.bf16 %v1851_v21  ;;  %v1853_v44 = vunpack.i.h.bf16 %v1851_v21  ;;  %v1907_v46 = vunpack.i.l.bf16 %v2452_v40 }
 0x1b7   :  { %1768 = vmatpush.xpose.msk.msra.mxu3 %vm289_vm1, %v572_v22 }
 0x1ba   :  { %v329_v26 = vpop.f32.mrf.mxu1 }
 0x1bb   :  { %v2432_v27 = vsel %vm2426_vm5, %v329_v26, -1e+30  ;;  %1769 = vmatpush.xpose.msk.msra.mxu3 %vm289_vm1, %v570_v14 }
 0x1bc   :  { %v792_v63 = vsel %vm785_vm3, %v2432_v27, -inf }
 0x1bd   :  { %1781 = vmatmul.msk.f32.gmra.mxu1 %vm289_vm1, %v2249_v2  ;;  %v1866_v29 = vpop.permute.xlu1 %1865  ;;  %793 = vmax.xlane.f32.xlu2 %v792_v63  ;;  %v1848_v2 = vunpack.i.h.bf16 %v2368_v45 }
 0x1be   :  { %v1867_v31 = vunpack.i.l.bf16 %v1866_v29  ;;  %1788 = vmatmul.msk.f32.gmra.mxu2 %vm289_vm1, %v2199_v51  ;;  %v1886_v32 = vpop.permute.xlu0 %1885  ;;  %v1868_v47 = vunpack.i.h.bf16 %v1866_v29 }
 0x1bf   :  { %v1887_v33 = vunpack.i.l.bf16 %v1886_v32  ;;  %1770 = vmatpush.xpose.msk.msra.mxu3 %vm289_vm1, %v568_v60  ;;  %v1888_v36 = vunpack.i.h.bf16 %v1886_v32 }
 0x1c0   :  { %1376 = vmatpush.msra.mxu2 %v1867_v31 }
 0x1c1   :  { %1482 = vmatpush.msra.mxu1 %v1887_v33 }
 0x1c2   :  { %1771 = vmatmul.msk.f32.vlgmr.msra.gmra.mxu3 %vm289_vm1, %v2279_v11  ;;  %v332_v38 = vpop.f32.mrf.mxu1  ;;  %1377 = vmatpush.msra.mxu2 %v1872_v34 }
 0x1c3   :  { %1270 = vmatpush.msrb.mxu3 %v1847_v30  ;;  %v2456_v41 = vsel %vm2444_vm6, %v332_v38, -1e+30  ;;  %1483 = vmatpush.msra.mxu1 %v1888_v36 }
 0x1c4   :  { %1378 = vmatpush.msra.mxu2 %v1877_v37  ;;  %v795_v42 = vsel %vm785_vm3, %v2456_v41, -inf }
 0x1c5   :  { %1271 = vmatpush.msrb.mxu3 %v1848_v2  ;;  %1782 = vmatmul.msk.f32.gmra.mxu1 %vm289_vm1, %v2258_v5  ;;  %v1891_v45 = vpop.permute.xlu1 %1890 }
 0x1c6   :  { %796 = vmax.xlane.f32.xlu1 %v795_v42  ;;  %v1892_v48 = vunpack.i.l.bf16 %v1891_v45  ;;  %1789 = vmatmul.msk.f32.gmra.mxu2 %vm289_vm1, %v2205_v53  ;;  %v2465_v50 = vpop.permute.xlu0 %1895  ;;  %v1893_v5 = vunpack.i.h.bf16 %v1891_v45 }
 0x1c7   :  { %1272 = vmatpush.msrb.mxu3 %v1852_v39  ;;  %v1897_v56 = vunpack.i.l.bf16 %v2465_v50  ;;  %1379 = vmatpush.msra.mxu2 %v1882_v43 }
 0x1c8   :  { %1484 = vmatpush.msra.mxu1 %v1892_v48 }
 0x1c9   :  { %1273 = vmatpush.msrb.mxu3 %v1853_v44  ;;  %1535 = vmatpush.msrb.mxu2 %v1907_v46 }
 0x1ca   :  { %1772 = vmatmul.msk.f32.gmra.mxu3 %vm289_vm1, %v2290_v13  ;;  %1485 = vmatpush.msra.mxu1 %v1893_v5 }
 0x1cb   :  { %1429 = vmatpush.msra.mxu3 %v1868_v47  ;;  %1536 = vmatpush.msrb.mxu2 %v1897_v56 }
 0x1cd   :  { %1430 = vmatpush.msra.mxu3 %v1873_v58 }
 0x1ce   :  { %1790 = vmatmul.msk.f32.gmra.mxu2 %vm289_vm1, %v2211_v55  ;;  %v2474_v60 = vpop.permute.xlu0 %1900 }
 0x1cf   :  { %1431 = vmatpush.msra.mxu3 %v1878_v59  ;;  %v1902_v54 = vunpack.i.l.bf16 %v2474_v60 }
 0x1d0   :  { %v380_v0 = vpop.f32.mrf.mxu2 }
 0x1d1   :  { %1432 = vmatpush.msra.mxu3 %v1883_v61  ;;  %v2479_v52 = vsel %vm2395_vm2, %v380_v0, -1e+30  ;;  %1537 = vmatpush.msrb.mxu2 %v1902_v54 }
 0x1d2   :  { %v798_v13 = vsel %vm785_vm3, %v2479_v52, -inf  ;;  %1773 = vmatmul.msk.f32.gmra.mxu3 %vm289_vm1, %v2304_v19 }
 0x1d3   :  { %799 = vmax.xlane.f32.xlu0 %v798_v13 }
 0x1d8   :  { %v383_v3 = vpop.f32.mrf.mxu2 }
 0x1d9   :  { %v2487_v4 = vsel %vm2411_vm4, %v383_v3, -1e+30 }
 0x1da   :  { %v801_v6 = vsel %vm785_vm3, %v2487_v4, -inf  ;;  %1774 = vmatmul.msk.f32.gmra.mxu3 %vm289_vm1, %v2319_v25 }
 0x1db   :  { %802 = vmax.xlane.f32.xlu2 %v801_v6 }
 0x1e0   :  { %v386_v7 = vpop.f32.mrf.mxu2 }
 0x1e1   :  { %v2495_v8 = vsel %vm2426_vm5, %v386_v7, -1e+30 }
 0x1e2   :  { %v804_v19 = vsel %vm785_vm3, %v2495_v8, -inf }
 0x1e3   :  { %805 = vmax.xlane.f32.xlu0 %v804_v19 }
 0x1e4   :  { %v437_v10 = vpop.f32.mrf.mxu3 }
 0x1e5   :  { %v2501_v12 = vsel %vm2395_vm2, %v437_v10, -1e+30 }
 0x1e6   :  { %v810_v25 = vsel %vm785_vm3, %v2501_v12, -inf }
 0x1e8   :  { %v389_v14 = vpop.f32.mrf.mxu2 }
 0x1e9   :  { %v2505_v15 = vsel %vm2444_vm6, %v389_v14, -1e+30 }
 0x1ea   :  { %v807_v17 = vsel %vm785_vm3, %v2505_v15, -inf }
 0x1eb   :  { %811 = vmax.xlane.f32.xlu0 %v810_v25  ;;  %808 = vmax.xlane.f32.xlu2 %v807_v17 }
 0x1ec   :  { %v440_v20 = vpop.f32.mrf.mxu3 }
 0x1ed   :  { %v2513_v9 = vsel %vm2411_vm4, %v440_v20, -1e+30 }
 0x1ee   :  { %v813_v21 = vsel %vm785_vm3, %v2513_v9, -inf }
 0x1f3   :  { %814 = vmax.xlane.f32.xlu0 %v813_v21 }
 0x1f4   :  { %v443_v22 = vpop.f32.mrf.mxu3 }
 0x1f5   :  { %v2519_v24 = vsel %vm2426_vm5, %v443_v22, -1e+30 }
 0x1f6   :  { %v816_v26 = vsel %vm785_vm3, %v2519_v24, -inf }
 0x1fb   :  { %817 = vmax.xlane.f32.xlu0 %v816_v26 }
 0x1fc   :  { %v446_v63 = vpop.f32.mrf.mxu3 }
 0x1fd   :  { %v2525_v28 = vsel %vm2444_vm6, %v446_v63, -1e+30 }
 0x1fe   :  { %v819_v29 = vsel %vm785_vm3, %v2525_v28, -inf }
 0x1ff   :  { %820 = vmax.xlane.f32.xlu1 %v819_v29 }
 0x20a   :  { %v494_v30 = vpop.f32.mrf.mxu1 }
 0x20b   :  { %v2531_v31 = vsel %vm2395_vm2, %v494_v30, -1e+30 }
 0x20c   :  { %v822_v32 = vsel %vm785_vm3, %v2531_v31, -inf }
 0x20d   :  { %823 = vmax.xlane.f32.xlu1 %v822_v32 }
 0x212   :  { %v497_v33 = vpop.f32.mrf.mxu1 }
 0x213   :  { %v2537_v34 = vsel %vm2411_vm4, %v497_v33, -1e+30 }
 0x214   :  { %v825_v2 = vsel %vm785_vm3, %v2537_v34, -inf }
 0x215   :  { %826 = vmax.xlane.f32.xlu1 %v825_v2 }
 0x218   :  { %v551_v39 = vpop.f32.mrf.mxu2 }
 0x219   :  { %v2568_v3 = vsel %vm2395_vm2, %v551_v39, -1e+30 }
 0x21a   :  { %v500_v36 = vpop.f32.mrf.mxu1 }
 0x21b   :  { %v2543_v37 = vsel %vm2426_vm5, %v500_v36, -1e+30 }
 0x21c   :  { %v828_v38 = vsel %vm785_vm3, %v2543_v37, -inf }
 0x21d   :  { %829 = vmax.xlane.f32.xlu1 %v828_v38 }
 0x220   :  { %v788_v42 = vpop.xlane.xlu2 %787  ;;  %v554_v58 = vpop.f32.mrf.mxu2 }
 0x221   :  { %v882_v43 = vsub.f32 %v2402_v62, %v788_v42  ;;  %v2584_v21 = vsel %vm2411_vm4, %v554_v58, -1e+30 }
 0x222   :  { %v503_v44 = vpop.f32.mrf.mxu1  ;;  %v837_v32 = vsel %vm785_vm3, %v2584_v21, -inf }
 0x223   :  { %v914_v45 = vmul.f32 1.442695, %v882_v43  ;;  %v2550_v46 = vsel %vm2444_vm6, %v503_v44, -1e+30 }
 0x224   :  { %v831_v47 = vsel %vm785_vm3, %v2550_v46, -inf }
 0x225   :  { %1924 = vpow2.f32 %v914_v45  ;;  %832 = vmax.xlane.f32.xlu2 %v831_v47 }
 0x228   :  { %v791_v48 = vpop.xlane.xlu1 %790  ;;  %v557_v14 = vpop.f32.mrf.mxu2 }
 0x229   :  { %v883_v56 = vsub.f32 %v2417_v18, %v791_v48  ;;  %v2595_v2 = vsel %vm2426_vm5, %v557_v14, -1e+30 }
 0x22a   :  { %v665_v5 = vpop.f32.mrf.mxu1  ;;  %v840_v38 = vsel %vm785_vm3, %v2595_v2, -inf }
 0x22b   :  { %v2555_v59 = vpop.eup %1924  ;;  %v916_v61 = vmul.f32 1.442695, %v883_v56  ;;  %v2559_v62 = vsel %vm2395_vm2, %v665_v5, -1e+30 }
 0x22c   :  { %v858_v54 = vsel %vm785_vm3, %v2559_v62, -inf  ;;  %v978_v0 = vsel %vm785_vm3, %v2555_v59, 0.0 }
 0x22d   :  { %1926 = vpow2.f32 %v916_v61  ;;  %859 = vmax.xlane.f32.xlu0 %v858_v54  ;;  %979 = vadd.xlane.f32.xlu2 %v978_v0 }
 0x230   :  { %v794_v13 = vpop.xlane.xlu2 %793 }
 0x231   :  { %v884_v18 = vsub.f32 %v2432_v27, %v794_v13  ;;  %v834_v27 = vsel %vm785_vm3, %v2568_v3, -inf  ;;  %v560_v33 = vpop.f32.mrf.mxu2 }
 0x232   :  { %v668_v6 = vpop.f32.mrf.mxu1  ;;  %v2612_v56 = vsel %vm2444_vm6, %v560_v33, -1e+30 }
 0x233   :  { %v2570_v7 = vpop.eup %1926  ;;  %v918_v19 = vmul.f32 1.442695, %v884_v18  ;;  %v2574_v10 = vsel %vm2411_vm4, %v668_v6, -1e+30  ;;  %v843_v54 = vsel %vm785_vm3, %v2612_v56, -inf }
 0x234   :  { %v981_v25 = vsel %vm785_vm3, %v2570_v7, 0.0  ;;  %v861_v17 = vsel %vm785_vm3, %v2574_v10, -inf }
 0x235   :  { %1928 = vpow2.f32 %v918_v19  ;;  %982 = vadd.xlane.f32.xlu1 %v981_v25  ;;  %862 = vmax.xlane.f32.xlu0 %v861_v17 }
 0x236   :  { %835 = vmax.xlane.f32.xlu2 %v834_v27 }
 0x239   :  { %v797_v20 = vpop.xlane.xlu1 %796  ;;  %v722_v48 = vpop.f32.mrf.mxu2 }
 0x23a   :  { %v885_v22 = vsub.f32 %v2456_v41, %v797_v20  ;;  %v671_v30 = vpop.f32.mrf.mxu1  ;;  %v2633_v25 = vsel %vm2395_vm2, %v722_v48, -1e+30 }
 0x23b   :  { %v2587_v26 = vpop.eup %1928  ;;  %v2599_v41 = vsel %vm2426_vm5, %v671_v30, -1e+30 }
 0x23c   :  { %v920_v63 = vmul.f32 1.442695, %v885_v22  ;;  %v984_v29 = vsel %vm785_vm3, %v2587_v26, 0.0  ;;  %v864_v43 = vsel %vm785_vm3, %v2599_v41, -inf }
 0x23d   :  { %985 = vadd.xlane.f32.xlu0 %v984_v29 }
 0x23e   :  { %1930 = vpow2.f32 %v920_v63  ;;  %838 = vmax.xlane.f32.xlu2 %v837_v32 }
 0x241   :  { %v725_v17 = vpop.f32.mrf.mxu2 }
 0x242   :  { %v674_v45 = vpop.f32.mrf.mxu1  ;;  %v2650_v33 = vsel %vm2411_vm4, %v725_v17, -1e+30 }
 0x243   :  { %v2616_v5 = vsel %vm2444_vm6, %v674_v45, -1e+30 }
 0x244   :  { %v2601_v36 = vpop.eup %1930  ;;  %v867_v0 = vsel %vm785_vm3, %v2616_v5, -inf }
 0x245   :  { %v608_v39 = vpop.f32.mrf.mxu3  ;;  %v987_v42 = vsel %vm785_vm3, %v2601_v36, 0.0  ;;  %841 = vmax.xlane.f32.xlu0 %v840_v38 }
 0x246   :  { %988 = vadd.xlane.f32.xlu1 %v987_v42  ;;  %865 = vmax.xlane.f32.xlu2 %v864_v43  ;;  %v800_v44 = vpop.xlane.xlu0 %799  ;;  %v2620_v61 = vsel %vm2395_vm2, %v608_v39, -1e+30 }
 0x247   :  { %v886_v47 = vsub.f32 %v2479_v52, %v800_v44  ;;  %v846_v52 = vsel %vm785_vm3, %v2620_v61, -inf }
 0x249   :  { %v922_v58 = vmul.f32 1.442695, %v886_v47  ;;  %v728_v39 = vpop.f32.mrf.mxu2 }
 0x24b   :  { %1932 = vpow2.f32 %v922_v58 }
 0x24d   :  { %844 = vmax.xlane.f32.xlu0 %v843_v54  ;;  %v611_v13 = vpop.f32.mrf.mxu3  ;;  %v2671_v54 = vsel %vm2426_vm5, %v728_v39, -1e+30 }
 0x24e   :  { %847 = vmax.xlane.f32.xlu1 %v846_v52  ;;  %868 = vmax.xlane.f32.xlu2 %v867_v0  ;;  %v803_v18 = vpop.xlane.xlu2 %802  ;;  %v2637_v27 = vsel %vm2411_vm4, %v611_v13, -1e+30 }
 0x24f   :  { %v887_v6 = vsub.f32 %v2487_v4, %v803_v18  ;;  %v849_v22 = vsel %vm785_vm3, %v2637_v27, -inf  ;;  %v870_v4 = vsel %vm785_vm3, %v2633_v25, -inf }
 0x251   :  { %v2629_v19 = vpop.eup %1932  ;;  %v924_v14 = vmul.f32 1.442695, %v887_v6  ;;  %v731_v6 = vpop.f32.mrf.mxu2 }
 0x252   :  { %v990_v20 = vsel %vm785_vm3, %v2629_v19, 0.0  ;;  %v2682_v17 = vsel %vm2444_vm6, %v731_v6, -1e+30 }
 0x253   :  { %1934 = vpow2.f32 %v924_v14 }
 0x255   :  { %991 = vadd.xlane.f32.xlu0 %v990_v20  ;;  %v614_v63 = vpop.f32.mrf.mxu3 }
 0x256   :  { %850 = vmax.xlane.f32.xlu1 %v849_v22  ;;  %871 = vmax.xlane.f32.xlu2 %v870_v4  ;;  %v806_v1 = vpop.xlane.xlu0 %805  ;;  %v2654_v38 = vsel %vm2426_vm5, %v614_v63, -1e+30  ;;  %v879_v22 = vsel %vm785_vm3, %v2682_v17, -inf }
 0x257   :  { %v888_v29 = vsub.f32 %v2495_v8, %v806_v1  ;;  %v852_v43 = vsel %vm785_vm3, %v2654_v38, -inf  ;;  %v873_v8 = vsel %vm785_vm3, %v2650_v33, -inf }
 0x259   :  { %v2646_v30 = vpop.eup %1934  ;;  %v926_v32 = vmul.f32 1.442695, %v888_v29 }
 0x25a   :  { %v993_v42 = vsel %vm785_vm3, %v2646_v30, 0.0 }
 0x25b   :  { %1936 = vpow2.f32 %v926_v32 }
 0x25d   :  { %994 = vadd.xlane.f32.xlu0 %v993_v42  ;;  %v617_v44 = vpop.f32.mrf.mxu3 }
 0x25e   :  { %853 = vmax.xlane.f32.xlu1 %v852_v43  ;;  %874 = vmax.xlane.f32.xlu2 %v873_v8  ;;  %v812_v16 = vpop.xlane.xlu0 %811  ;;  %v809_v45 = vpop.xlane.xlu2 %808  ;;  %v2665_v48 = vsel %vm2444_vm6, %v617_v44, -1e+30 }
 0x25f   :  { %v889_v47 = vsub.f32 %v2505_v15, %v809_v45  ;;  %v890_v0 = vsub.f32 %v2501_v12, %v812_v16  ;;  %v855_v13 = vsel %vm785_vm3, %v2665_v48, -inf  ;;  %v876_v15 = vsel %vm785_vm3, %v2671_v54, -inf }
 0x261   :  { %v2667_v58 = vpop.eup %1936  ;;  %v928_v52 = vmul.f32 1.442695, %v889_v47  ;;  %v930_v14 = vmul.f32 1.442695, %v890_v0 }
 0x262   :  { %v996_v18 = vsel %vm785_vm3, %v2667_v58, 0.0 }
 0x263   :  { %1938 = vpow2.f32 %v928_v52 }
 0x264   :  { %1940 = vpow2.f32 %v930_v14 }
 0x265   :  { %856 = vmax.xlane.f32.xlu0 %v855_v13 }
 0x266   :  { %877 = vmax.xlane.f32.xlu1 %v876_v15  ;;  %997 = vadd.xlane.f32.xlu2 %v996_v18  ;;  %v815_v23 = vpop.xlane.xlu0 %814 }
 0x267   :  { %v891_v20 = vsub.f32 %v2513_v9, %v815_v23 }
 0x269   :  { %v2684_v12 = vpop.eup %1938  ;;  %v932_v63 = vmul.f32 1.442695, %v891_v20 }
 0x26a   :  { %v999_v4 = vsel %vm785_vm3, %v2684_v12, 0.0  ;;  %v2692_v35 = vpop.eup %1940 }
 0x26b   :  { %1942 = vpow2.f32 %v932_v63  ;;  %v1002_v42 = vsel %vm785_vm3, %v2692_v35, 0.0 }
 0x26d   :  { %880 = vmax.xlane.f32.xlu0 %v879_v22 }
 0x26e   :  { %1000 = vadd.xlane.f32.xlu1 %v999_v4  ;;  %v818_v1 = vpop.xlane.xlu0 %817 }
 0x26f   :  { %v892_v29 = vsub.f32 %v2519_v24, %v818_v1 }
 0x271   :  { %v934_v32 = vmul.f32 1.442695, %v892_v29  ;;  %v2697_v8 = vpop.eup %1942 }
 0x272   :  { %v821_v39 = vpop.xlane.xlu1 %820  ;;  %v1005_v16 = vsel %vm785_vm3, %v2697_v8, 0.0 }
 0x273   :  { %1944 = vpow2.f32 %v934_v32  ;;  %v893_v9 = vsub.f32 %v2525_v28, %v821_v39 }
 0x275   :  { %1003 = vadd.xlane.f32.xlu0 %v1002_v42  ;;  %v936_v43 = vmul.f32 1.442695, %v893_v9 }
 0x277   :  { %1946 = vpow2.f32 %v936_v43 }
 0x279   :  { %v2699_v44 = vpop.eup %1944 }
 0x27a   :  { %v1008_v24 = vsel %vm785_vm3, %v2699_v44, 0.0 }
 0x27b   :  { %1009 = vadd.xlane.f32.xlu2 %v1008_v24 }
 0x27d   :  { %1006 = vadd.xlane.f32.xlu0 %v1005_v16  ;;  %v2705_v28 = vpop.eup %1946 }
 0x27e   :  { %v1011_v0 = vsel %vm785_vm3, %v2705_v28, 0.0 }
 0x280   :  { %v824_v45 = vpop.xlane.xlu1 %823 }
 0x281   :  { %v894_v47 = vsub.f32 %v2531_v31, %v824_v45 }
 0x283   :  { %v938_v52 = vmul.f32 1.442695, %v894_v47 }
 0x285   :  { %1948 = vpow2.f32 %v938_v52  ;;  %1012 = vadd.xlane.f32.xlu0 %v1011_v0 }
 0x288   :  { %v827_v13 = vpop.xlane.xlu1 %826 }
 0x289   :  { %v895_v15 = vsub.f32 %v2537_v34, %v827_v13 }
 0x28b   :  { %v2711_v18 = vpop.eup %1948  ;;  %v940_v6 = vmul.f32 1.442695, %v895_v15 }
 0x28c   :  { %v1014_v23 = vsel %vm785_vm3, %v2711_v18, 0.0 }
 0x28d   :  { %1950 = vpow2.f32 %v940_v6  ;;  %1015 = vadd.xlane.f32.xlu2 %v1014_v23 }
 0x290   :  { %v830_v14 = vpop.xlane.xlu1 %829 }
 0x291   :  { %v896_v31 = vsub.f32 %v2543_v37, %v830_v14 }
 0x293   :  { %v2716_v20 = vpop.eup %1950  ;;  %v942_v22 = vmul.f32 1.442695, %v896_v31 }
 0x294   :  { %v1017_v4 = vsel %vm785_vm3, %v2716_v20, 0.0 }
 0x295   :  { %1952 = vpow2.f32 %v942_v22  ;;  %1018 = vadd.xlane.f32.xlu2 %v1017_v4 }
 0x298   :  { %v833_v34 = vpop.xlane.xlu2 %832 }
 0x299   :  { %v897_v63 = vsub.f32 %v2550_v46, %v833_v34 }
 0x29b   :  { %v2721_v1 = vpop.eup %1952  ;;  %v944_v29 = vmul.f32 1.442695, %v897_v63 }
 0x29c   :  { %v1020_v32 = vsel %vm785_vm3, %v2721_v1, 0.0 }
 0x29d   :  { %1954 = vpow2.f32 %v944_v29  ;;  %1021 = vadd.xlane.f32.xlu0 %v1020_v32 }
 0x2a0   :  { %v860_v37 = vpop.xlane.xlu0 %859  ;;  %v980_v39 = vpop.xlane.xlu2 %979 }
 0x2a1   :  { %v906_v9 = vsub.f32 %v2559_v62, %v860_v37  ;;  %1956 = vrcp.f32 %v980_v39 }
 0x2a3   :  { %v2726_v42 = vpop.eup %1954  ;;  %v962_v43 = vmul.f32 1.442695, %v906_v9 }
 0x2a4   :  { %v1023_v24 = vsel %vm785_vm3, %v2726_v42, 0.0 }
 0x2a5   :  { %1958 = vpow2.f32 %v962_v43  ;;  %1024 = vadd.xlane.f32.xlu2 %v1023_v24 }
 0x2a7   :  { %v1957_v46 = vpop.eup %1956 }
 0x2a8   :  { %v1106_v16 = vmul.f32 %v1957_v46, %v980_v39  ;;  %v983_v45 = vpop.xlane.xlu1 %982  ;;  %v863_v47 = vpop.xlane.xlu0 %862 }
 0x2a9   :  { %1960 = vrcp.f32 %v983_v45  ;;  %v907_v52 = vsub.f32 %v2574_v10, %v863_v47  ;;  %v836_v0 = vpop.xlane.xlu2 %835  ;;  %v1908_v10 = vunpack.i.h.bf16 %v2452_v40 }
 0x2aa   :  { %v1138_v13 = vsub.f32 2.0, %v1106_v16  ;;  %v898_v62 = vsub.f32 %v2568_v3, %v836_v0  ;;  %v1898_v3 = vunpack.i.h.bf16 %v2465_v50 }
 0x2ab   :  { %v2732_v15 = vpop.eup %1958  ;;  %v964_v6 = vmul.f32 1.442695, %v907_v52 }
 0x2ac   :  { %v1170_v23 = vmul.f32 %v1957_v46, %v1138_v13  ;;  %v946_v14 = vmul.f32 1.442695, %v898_v62  ;;  %v1050_v31 = vsel %vm785_vm3, %v2732_v15, 0.0 }
 0x2ad   :  { %1962 = vpow2.f32 %v964_v6  ;;  %1051 = vadd.xlane.f32.xlu2 %v1050_v31 }
 0x2ae   :  { %v1202_v22 = vmul.f32 %v2555_v59, %v1170_v23  ;;  %1964 = vpow2.f32 %v946_v14  ;;  %v1903_v59 = vunpack.i.h.bf16 %v2474_v60 }
 0x2af   :  { %v1961_v4 = vpop.eup %1960 }
 0x2b0   :  { %v1107_v34 = vmul.f32 %v1961_v4, %v983_v45  ;;  %v986_v63 = vpop.xlane.xlu0 %985  ;;  %1791 = vmatmul.msk.f32.vlgmr.msrb.gmra.mxu3 %vm785_vm3, %v1202_v22 }
 0x2b1   :  { %1966 = vrcp.f32 %v986_v63  ;;  %v839_v29 = vpop.xlane.xlu2 %838  ;;  %1588 = vmatpush.msrb.mxu3 %v1908_v10 }
 0x2b2   :  { %v1139_v32 = vsub.f32 2.0, %v1107_v34  ;;  %v899_v37 = vsub.f32 %v2584_v21, %v839_v29 }
 0x2b3   :  { %v2741_v39 = vpop.eup %1962  ;;  %1589 = vmatpush.msrb.mxu3 %v1898_v3 }
 0x2b4   :  { %v2744_v9 = vpop.eup %1964  ;;  %v1171_v40 = vmul.f32 %v1961_v4, %v1139_v32  ;;  %v948_v43 = vmul.f32 1.442695, %v899_v37  ;;  %v1053_v24 = vsel %vm785_vm3, %v2741_v39, 0.0 }
 0x2b5   :  { %1590 = vmatpush.msrb.mxu3 %v1903_v59  ;;  %1054 = vadd.xlane.f32.xlu0 %v1053_v24  ;;  %v1026_v50 = vsel %vm785_vm3, %v2744_v9, 0.0 }
 0x2b6   :  { %1968 = vpow2.f32 %v948_v43  ;;  %1027 = vadd.xlane.f32.xlu1 %v1026_v50  ;;  %v1203_v21 = vmul.f32 %v2570_v7, %v1171_v40 }
 0x2b7   :  { %v1967_v46 = vpop.eup %1966 }
 0x2b8   :  { %v1108_v16 = vmul.f32 %v1967_v46, %v986_v63  ;;  %v842_v60 = vpop.xlane.xlu0 %841  ;;  %1792 = vmatmul.msk.f32.gmra.mxu3 %vm785_vm3, %v1203_v21 }
 0x2b9   :  { %v989_v45 = vpop.xlane.xlu1 %988  ;;  %v900_v47 = vsub.f32 %v2595_v2, %v842_v60  ;;  %v2753_v52 = vpop.xlane.xlu2 %865 }
 0x2ba   :  { %v1140_v0 = vsub.f32 2.0, %v1108_v16  ;;  %1970 = vrcp.f32 %v989_v45 }
 0x2bb   :  { %v950_v13 = vmul.f32 1.442695, %v900_v47 }
 0x2bc   :  { %v2755_v62 = vpop.eup %1968  ;;  %v1172_v6 = vmul.f32 %v1967_v46, %v1140_v0 }
 0x2bd   :  { %1972 = vpow2.f32 %v950_v13  ;;  %v1029_v7 = vsel %vm785_vm3, %v2755_v62, 0.0 }
 0x2be   :  { %1030 = vadd.xlane.f32.xlu1 %v1029_v7  ;;  %v1204_v23 = vmul.f32 %v2587_v26, %v1172_v6  ;;  %v1914_v26 = vpack.i.bf16 %v2205_v53, %v2211_v55 }
 0x2c0   :  { %v1971_v14 = vpop.eup %1970  ;;  %v2760_v31 = vpop.xlane.xlu0 %844  ;;  %1793 = vmatmul.msk.f32.gmra.mxu3 %vm785_vm3, %v1204_v23 }
 0x2c1   :  { %v1109_v2 = vmul.f32 %v1971_v14, %v989_v45  ;;  %v848_v22 = vpop.xlane.xlu1 %847  ;;  %v2763_v4 = vpop.xlane.xlu2 %868 }
 0x2c2   :  { %v902_v10 = vsub.f32 %v2620_v61, %v848_v22 }
 0x2c3   :  { %v2766_v34 = vpop.eup %1972  ;;  %v1141_v63 = vsub.f32 2.0, %v1109_v2 }
 0x2c4   :  { %v954_v3 = vmul.f32 1.442695, %v902_v10  ;;  %v1032_v29 = vsel %vm785_vm3, %v2766_v34, 0.0 }
 0x2c5   :  { %v1173_v32 = vmul.f32 %v1971_v14, %v1141_v63  ;;  %1033 = vadd.xlane.f32.xlu2 %v1032_v29 }
 0x2c6   :  { %1974 = vpow2.f32 %v954_v3 }
 0x2c7   :  { %v1205_v37 = vmul.f32 %v2601_v36, %v1173_v32  ;;  %v901_v32 = vsub.f32 %v2612_v56, %v2760_v31 }
 0x2c8   :  { %v992_v59 = vpop.xlane.xlu0 %991 }
 0x2c9   :  { %v2773_v40 = vpop.xlane.xlu1 %850  ;;  %1976 = vrcp.f32 %v992_v59  ;;  %1794 = vmatmul.msk.f32.gmra.mxu3 %vm785_vm3, %v1205_v37  ;;  %v872_v61 = vpop.xlane.xlu2 %871  ;;  %1915 = vrot.lane.b32.xlu0 %v1914_v26, %s2082_s3 }
 0x2ca   :  { %v910_v56 = vsub.f32 %v2633_v25, %v872_v61 }
 0x2cc   :  { %v2777_v43 = vpop.eup %1974 }
 0x2cd   :  { %v1038_v24 = vsel %vm785_vm3, %v2777_v43, 0.0 }
 0x2ce   :  { %1039 = vadd.xlane.f32.xlu1 %v1038_v24  ;;  %v952_v24 = vmul.f32 1.442695, %v901_v32 }
 0x2cf   :  { %v1977_v50 = vpop.eup %1976 }
 0x2d0   :  { %v1110_v21 = vmul.f32 %v1977_v50, %v992_v59  ;;  %v995_v53 = vpop.xlane.xlu0 %994 }
 0x2d1   :  { %v854_v55 = vpop.xlane.xlu1 %853  ;;  %1978 = vrcp.f32 %v995_v53  ;;  %v875_v36 = vpop.xlane.xlu2 %874 }
 0x2d2   :  { %v1142_v46 = vsub.f32 2.0, %v1110_v21  ;;  %v911_v16 = vsub.f32 %v2650_v33, %v875_v36  ;;  %v904_v47 = vsub.f32 %v2654_v38, %v854_v55  ;;  %v1909_v33 = vpack.i.bf16 %v2219_v57, %v2279_v11 }
 0x2d4   :  { %v1174_v60 = vmul.f32 %v1977_v50, %v1142_v46  ;;  %v972_v45 = vmul.f32 1.442695, %v911_v16  ;;  %v958_v23 = vmul.f32 1.442695, %v904_v47  ;;  %v909_v50 = vsub.f32 %v2616_v5, %v2763_v4 }
 0x2d5   :  { %v970_v5 = vmul.f32 1.442695, %v910_v56 }
 0x2d6   :  { %v1206_v0 = vmul.f32 %v2629_v19, %v1174_v60  ;;  %1980 = vpow2.f32 %v972_v45  ;;  %v968_v36 = vmul.f32 1.442695, %v909_v50 }
 0x2d7   :  { %v1979_v13 = vpop.eup %1978 }
 0x2d8   :  { %v1111_v6 = vmul.f32 %v1979_v13, %v995_v53  ;;  %1795 = vmatmul.msk.f32.vlgmr.msrb.gmra.mxu1 %vm785_vm3, %v1206_v0  ;;  %v2785_v7 = vpop.xlane.xlu0 %856 }
 0x2d9   :  { %v878_v14 = vpop.xlane.xlu1 %877  ;;  %v998_v2 = vpop.xlane.xlu2 %997 }
 0x2da   :  { %v1143_v22 = vsub.f32 2.0, %v1111_v6  ;;  %1982 = vrcp.f32 %v998_v2  ;;  %v912_v19 = vsub.f32 %v2671_v54, %v878_v14 }
 0x2db   :  { %1984 = vpow2.f32 %v958_v23 }
 0x2dc   :  { %v1175_v10 = vmul.f32 %v1979_v13, %v1143_v22  ;;  %v2789_v63 = vpop.eup %1980  ;;  %v974_v11 = vmul.f32 1.442695, %v912_v19  ;;  %v903_v22 = vsub.f32 %v2637_v27, %v2773_v40 }
 0x2dd   :  { %1910 = vrot.lane.b32.xlu2 %v1909_v33, %s2082_s3  ;;  %v1065_v38 = vsel %vm785_vm3, %v2789_v63, 0.0 }
 0x2de   :  { %v1207_v3 = vmul.f32 %v2646_v30, %v1175_v10  ;;  %1066 = vadd.xlane.f32.xlu1 %v1065_v38 }
 0x2e0   :  { %v1983_v29 = vpop.eup %1982  ;;  %1796 = vmatmul.msk.f32.gmra.mxu1 %vm785_vm3, %v1207_v3  ;;  %v881_v57 = vpop.xlane.xlu0 %880 }
 0x2e1   :  { %v1112_v26 = vmul.f32 %v1983_v29, %v998_v2  ;;  %v1001_v37 = vpop.xlane.xlu1 %1000  ;;  %v2799_v54 = vpop.eup %1984  ;;  %v913_v60 = vsub.f32 %v2682_v17, %v881_v57 }
 0x2e2   :  { %1986 = vrcp.f32 %v1001_v37  ;;  %v1044_v21 = vsel %vm785_vm3, %v2799_v54, 0.0 }
 0x2e3   :  { %v1144_v59 = vsub.f32 2.0, %v1112_v26  ;;  %1988 = vpow2.f32 %v974_v11  ;;  %v976_v23 = vmul.f32 1.442695, %v913_v60 }
 0x2e4   :  { %1990 = vpow2.f32 %v952_v24 }
 0x2e5   :  { %v1176_v30 = vmul.f32 %v1983_v29, %v1144_v59  ;;  %v956_v29 = vmul.f32 1.442695, %v903_v22 }
 0x2e6   :  { %1045 = vadd.xlane.f32.xlu1 %v1044_v21 }
 0x2e7   :  { %v1208_v31 = vmul.f32 %v2667_v58, %v1176_v30 }
 0x2e8   :  { %v1987_v53 = vpop.eup %1986  ;;  %v1004_v55 = vpop.xlane.xlu0 %1003 }
 0x2e9   :  { %v1113_v46 = vmul.f32 %v1987_v53, %v1001_v37  ;;  %1992 = vrcp.f32 %v1004_v55  ;;  %1797 = vmatmul.msk.f32.gmra.mxu1 %vm785_vm3, %v1208_v31  ;;  %v2808_v16 = vpop.eup %1988 }
 0x2ea   :  { %1994 = vpow2.f32 %v968_v36  ;;  %v2811_v25 = vpop.eup %1990  ;;  %v1068_v58 = vsel %vm785_vm3, %v2808_v16, 0.0 }
 0x2eb   :  { %v1145_v4 = vsub.f32 2.0, %v1113_v46  ;;  %1996 = vpow2.f32 %v970_v5  ;;  %v1035_v14 = vsel %vm785_vm3, %v2811_v25, 0.0 }
 0x2ed   :  { %v1177_v45 = vmul.f32 %v1987_v53, %v1145_v4 }
 0x2ee   :  { %v1010_v61 = vpop.xlane.xlu2 %1009  ;;  %1069 = vadd.xlane.f32.xlu1 %v1068_v58 }
 0x2ef   :  { %v1993_v47 = vpop.eup %1992  ;;  %v1209_v0 = vmul.f32 %v2684_v12, %v1177_v45  ;;  %1998 = vrcp.f32 %v1010_v61 }
 0x2f0   :  { %v1114_v13 = vmul.f32 %v1993_v47, %v1004_v55  ;;  %v1007_v6 = vpop.xlane.xlu0 %1006  ;;  %v2819_v2 = vpop.eup %1994 }
 0x2f1   :  { %2000 = vrcp.f32 %v1007_v6  ;;  %1798 = vmatmul.msk.f32.gmra.mxu1 %vm785_vm3, %v1209_v0  ;;  %v2823_v10 = vpop.eup %1996  ;;  %v1059_v38 = vsel %vm785_vm3, %v2819_v2, 0.0 }
 0x2f2   :  { %v1146_v17 = vsub.f32 2.0, %v1114_v13  ;;  %2002 = vpow2.f32 %v976_v23  ;;  %v1062_v40 = vsel %vm785_vm3, %v2823_v10, 0.0 }
 0x2f3   :  { %1036 = vadd.xlane.f32.xlu0 %v1035_v14 }
 0x2f4   :  { %v1178_v33 = vmul.f32 %v1993_v47, %v1146_v17 }
 0x2f5   :  { %v1999_v12 = vpop.eup %1998 }
 0x2f6   :  { %v1210_v19 = vmul.f32 %v2692_v35, %v1178_v33  ;;  %1060 = vadd.xlane.f32.xlu1 %v1059_v38  ;;  %v1116_v11 = vmul.f32 %v1999_v12, %v1010_v61  ;;  %v908_v35 = vsub.f32 %v2599_v41, %v2753_v52  ;;  %v1919_v61 = vpack.i.bf16 %v2191_v49, %v2199_v51 }
 0x2f7   :  { %v2001_v3 = vpop.eup %2000 }
 0x2f8   :  { %v1115_v32 = vmul.f32 %v2001_v3, %v1007_v6  ;;  %v1013_v57 = vpop.xlane.xlu0 %1012  ;;  %1799 = vmatmul.msk.f32.vlgmr.msra.gmra.mxu2 %vm785_vm3, %v1210_v19  ;;  %v2831_v26 = vpop.eup %2002  ;;  %v1148_v59 = vsub.f32 2.0, %v1116_v11  ;;  %v966_v21 = vmul.f32 1.442695, %v908_v35 }
 0x2f9   :  { %2004 = vrcp.f32 %v1013_v57  ;;  %v1071_v24 = vsel %vm785_vm3, %v2831_v26, 0.0 }
 0x2fa   :  { %v1147_v27 = vsub.f32 2.0, %v1115_v32  ;;  %2006 = vpow2.f32 %v956_v29  ;;  %v1180_v53 = vmul.f32 %v1999_v12, %v1148_v59 }
 0x2fb   :  { %1063 = vadd.xlane.f32.xlu0 %v1062_v40 }
 0x2fc   :  { %v1179_v37 = vmul.f32 %v2001_v3, %v1147_v27  ;;  %v1212_v36 = vmul.f32 %v2699_v44, %v1180_v53 }
 0x2fe   :  { %v1211_v50 = vmul.f32 %v2697_v8, %v1179_v37  ;;  %1072 = vadd.xlane.f32.xlu1 %v1071_v24 }
 0x2ff   :  { %v2005_v30 = vpop.eup %2004 }
 0x300   :  { %v1016_v56 = vpop.xlane.xlu2 %1015  ;;  %1800 = vmatmul.msk.f32.gmra.mxu2 %vm785_vm3, %v1211_v50  ;;  %v2839_v31 = vpop.eup %2006  ;;  %v1117_v55 = vmul.f32 %v2005_v30, %v1013_v57 }
 0x301   :  { %2008 = vrcp.f32 %v1016_v56  ;;  %v1041_v41 = vsel %vm785_vm3, %v2839_v31, 0.0 }
 0x302   :  { %2010 = vpow2.f32 %v966_v21  ;;  %v1149_v52 = vsub.f32 2.0, %v1117_v55 }
 0x304   :  { %v1181_v60 = vmul.f32 %v2005_v30, %v1149_v52 }
 0x306   :  { %1042 = vadd.xlane.f32.xlu2 %v1041_v41  ;;  %v1213_v44 = vmul.f32 %v2705_v28, %v1181_v60 }
 0x307   :  { %v2009_v8 = vpop.eup %2008 }
 0x308   :  { %v1118_v46 = vmul.f32 %v2009_v8, %v1016_v56  ;;  %v1019_v5 = vpop.xlane.xlu2 %1018  ;;  %1801 = vmatmul.msk.f32.gmra.mxu2 %vm785_vm3, %v1212_v36  ;;  %v2845_v4 = vpop.eup %2010 }
 0x309   :  { %2012 = vrcp.f32 %v1019_v5  ;;  %v1056_v47 = vsel %vm785_vm3, %v2845_v4, 0.0 }
 0x30a   :  { %v1150_v45 = vsub.f32 2.0, %v1118_v46 }
 0x30c   :  { %v1182_v58 = vmul.f32 %v2009_v8, %v1150_v45 }
 0x30e   :  { %v1214_v0 = vmul.f32 %v2711_v18, %v1182_v58  ;;  %1057 = vadd.xlane.f32.xlu2 %v1056_v47 }
 0x30f   :  { %v2013_v13 = vpop.eup %2012  ;;  %1920 = vrot.lane.b32.xlu0 %v1919_v61, %s2082_s3 }
 0x310   :  { %v1119_v6 = vmul.f32 %v2013_v13, %v1019_v5  ;;  %v1022_v23 = vpop.xlane.xlu0 %1021  ;;  %1802 = vmatmul.msk.f32.gmra.mxu2 %vm785_vm3, %v1213_v44  ;;  %1803 = vmatmul.msk.f32.vlgmr.msra.gmra.mxu3 %vm785_vm3, %v1214_v0 }
 0x311   :  { %2014 = vrcp.f32 %v1022_v23 }
 0x312   :  { %v1151_v17 = vsub.f32 2.0, %v1119_v6 }
 0x314   :  { %v1183_v49 = vmul.f32 %v2013_v13, %v1151_v17 }
 0x316   :  { %v1215_v51 = vmul.f32 %v2716_v20, %v1183_v49  ;;  %v905_v20 = vsub.f32 %v2665_v48, %v2785_v7 }
 0x317   :  { %v2015_v14 = vpop.eup %2014 }
 0x318   :  { %v1120_v22 = vmul.f32 %v2015_v14, %v1022_v23  ;;  %v1025_v18 = vpop.xlane.xlu2 %1024  ;;  %1804 = vmatmul.msk.f32.gmra.mxu3 %vm785_vm3, %v1215_v51  ;;  %v960_v27 = vmul.f32 1.442695, %v905_v20 }
 0x319   :  { %2016 = vrcp.f32 %v1025_v18 }
 0x31a   :  { %v1152_v28 = vsub.f32 2.0, %v1120_v22 }
 0x31c   :  { %v1184_v33 = vmul.f32 %v2015_v14, %v1152_v28 }
 0x31e   :  { %v1216_v12 = vmul.f32 %v2721_v1, %v1184_v33 }
 0x31f   :  { %v2017_v19 = vpop.eup %2016 }
 0x320   :  { %v1121_v38 = vmul.f32 %v2017_v19, %v1025_v18  ;;  %1805 = vmatmul.msk.f32.gmra.mxu3 %vm785_vm3, %v1216_v12  ;;  %v1052_v11 = vpop.xlane.xlu2 %1051 }
 0x322   :  { %v1153_v3 = vsub.f32 2.0, %v1121_v38 }
 0x324   :  { %v1185_v29 = vmul.f32 %v2017_v19, %v1153_v3 }
 0x326   :  { %v1217_v32 = vmul.f32 %v2726_v42, %v1185_v29 }
 0x328   :  { %1806 = vmatmul.msk.f32.gmra.mxu3 %vm785_vm3, %v1217_v32  ;;  %v1055_v37 = vpop.xlane.xlu0 %1054 }
 0x329   :  { %v1028_v57 = vpop.xlane.xlu1 %1027 }
 0x32a   :  { %2018 = vrcp.f32 %v1028_v57 }
 0x32b   :  { %2020 = vrcp.f32 %v1052_v11 }
 0x32c   :  { %2022 = vpow2.f32 %v960_v27 }
 0x330   :  { %v2019_v1 = vpop.eup %2018 }
 0x331   :  { %v1122_v40 = vmul.f32 %v2019_v1, %v1028_v57  ;;  %v1031_v35 = vpop.xlane.xlu1 %1030  ;;  %v2021_v59 = vpop.eup %2020 }
 0x332   :  { %2024 = vrcp.f32 %v1031_v35  ;;  %v2868_v48 = vpop.eup %2022  ;;  %v1130_v7 = vmul.f32 %v2021_v59, %v1052_v11 }
 0x333   :  { %v1154_v24 = vsub.f32 2.0, %v1122_v40  ;;  %v1275_v50 = vpop.f32.mrf.mxu3  ;;  %2026 = vrcp.f32 %v1055_v37  ;;  %v1047_v53 = vsel %vm785_vm3, %v2868_v48, 0.0 }
 0x334   :  { %1658 = vst.msk [vmem:[%s3030_s2] sm:$0xff] %vm289_vm1, %v1275_v50  ;;  %v1162_v41 = vsub.f32 2.0, %v1130_v7 }
 0x335   :  { %v1186_v42 = vmul.f32 %v2019_v1, %v1154_v24 }
 0x336   :  { %v1194_v60 = vmul.f32 %v2021_v59, %v1162_v41 }
 0x337   :  { %v1218_v30 = vmul.f32 %v2744_v9, %v1186_v42 }
 0x338   :  { %v2025_v21 = vpop.eup %2024  ;;  %v1034_v56 = vpop.xlane.xlu2 %1033  ;;  %v1226_v17 = vmul.f32 %v2732_v15, %v1194_v60 }
 0x339   :  { %v1123_v55 = vmul.f32 %v2025_v21, %v1031_v35  ;;  %1807 = vmatmul.msk.f32.vlgmr.msra.gmra.mxu1 %vm785_vm3, %v1218_v30  ;;  %2028 = vrcp.f32 %v1034_v56  ;;  %1048 = vadd.xlane.f32.xlu0 %v1047_v53  ;;  %v2027_v52 = vpop.eup %2026 }
 0x33a   :  { %v1131_v45 = vmul.f32 %v2027_v52, %v1055_v37 }
 0x33b   :  { %v1155_v36 = vsub.f32 2.0, %v1123_v55  ;;  %v1916_v8 = vpop.permute.xlu0 %1915  ;;  %v1278_v46 = vpop.f32.mrf.mxu3 }
 0x33c   :  { %v1917_v5 = vunpack.i.l.bf16 %v1916_v8  ;;  %1659 = vst.msk [vmem:[%s3030_s2 + $0x8] sm:$0xff] %vm289_vm1, %v1278_v46  ;;  %v1918_v58 = vunpack.i.h.bf16 %v1916_v8  ;;  %v1163_v49 = vsub.f32 2.0, %v1131_v45 }
 0x33d   :  { %v1187_v9 = vmul.f32 %v2025_v21, %v1155_v36 }
 0x33e   :  { %1641 = vmatpush.msrb.mxu1 %v1917_v5 }
 0x33f   :  { %v2029_v61 = vpop.eup %2028  ;;  %v1219_v47 = vmul.f32 %v2755_v62, %v1187_v9  ;;  %v1195_v62 = vmul.f32 %v2027_v52, %v1163_v49 }
 0x340   :  { %v1124_v0 = vmul.f32 %v2029_v61, %v1034_v56  ;;  %1642 = vmatpush.msrb.mxu1 %v1918_v58  ;;  %v1911_v44 = vpop.permute.xlu2 %1910 }
 0x341   :  { %v1040_v13 = vpop.xlane.xlu1 %1039  ;;  %1808 = vmatmul.msk.f32.gmra.mxu1 %vm785_vm3, %v1219_v47  ;;  %v1913_v6 = vunpack.i.h.bf16 %v1911_v44  ;;  %v1912_v23 = vunpack.i.l.bf16 %v1911_v44  ;;  %v1227_v15 = vmul.f32 %v2741_v39, %v1195_v62 }
 0x342   :  { %v1156_v51 = vsub.f32 2.0, %v1124_v0  ;;  %2030 = vrcp.f32 %v1040_v13 }
 0x343   :  { %v1281_v14 = vpop.f32.mrf.mxu3  ;;  %1538 = vmatpush.msrb.mxu2 %v1912_v23  ;;  %1591 = vmatpush.msrb.mxu3 %v1913_v6 }
 0x344   :  { %v1188_v22 = vmul.f32 %v2029_v61, %v1156_v51  ;;  %1660 = vst.msk [vmem:[%s3030_s2 + $0x10] sm:$0xff] %vm289_vm1, %v1281_v14  ;;  %1815 = vmatmul.msk.f32.vlgmr.msrb.gmra.mxu3 %vm785_vm3, %v1226_v17 }
 0x346   :  { %v1220_v18 = vmul.f32 %v2766_v34, %v1188_v22 }
 0x348   :  { %v2031_v28 = vpop.eup %2030 }
 0x349   :  { %v1126_v33 = vmul.f32 %v2031_v28, %v1040_v13  ;;  %1809 = vmatmul.msk.f32.gmra.mxu1 %vm785_vm3, %v1220_v18 }
 0x34b   :  { %v1158_v12 = vsub.f32 2.0, %v1126_v33 }
 0x34c   :  { %v1284_v19 = vpop.f32.mrf.mxu3  ;;  %1816 = vmatmul.msk.f32.gmra.mxu3 %vm785_vm3, %v1227_v15 }
 0x34d   :  { %v1190_v38 = vmul.f32 %v2031_v28, %v1158_v12  ;;  %1661 = vst.msk [vmem:[%s3030_s2 + $0x18] sm:$0xff] %vm289_vm1, %v1284_v19 }
 0x34f   :  { %v1222_v3 = vmul.f32 %v2777_v43, %v1190_v38 }
 0x351   :  { %1811 = vmatmul.msk.f32.vlgmr.msrb.gmra.mxu2 %vm785_vm3, %v1222_v3  ;;  %v1067_v39 = vpop.xlane.xlu1 %1066 }
 0x355   :  { %v1328_v34 = vpop.f32.mrf.mxu1 }
 0x356   :  { %1662 = vst.msk [vmem:[%s3030_s2 + $0x20] sm:$0xff] %vm289_vm1, %v1328_v34 }
 0x359   :  { %v1046_v57 = vpop.xlane.xlu1 %1045 }
 0x35d   :  { %v1331_v29 = vpop.f32.mrf.mxu1 }
 0x35e   :  { %1663 = vst.msk [vmem:[%s3030_s2 + $0x28] sm:$0xff] %vm289_vm1, %v1331_v29 }
 0x361   :  { %v1070_v35 = vpop.xlane.xlu1 %1069 }
 0x366   :  { %v1334_v32 = vpop.f32.mrf.mxu1  ;;  %v1037_v20 = vpop.xlane.xlu0 %1036 }
 0x367   :  { %1664 = vst.msk [vmem:[%s3030_s2 + $0x30] sm:$0xff] %vm289_vm1, %v1334_v32  ;;  %2032 = vrcp.f32 %v1037_v20 }
 0x369   :  { %v1061_v7 = vpop.xlane.xlu1 %1060 }
 0x36d   :  { %v2033_v43 = vpop.eup %2032 }
 0x36e   :  { %v1125_v11 = vmul.f32 %v2033_v43, %v1037_v20  ;;  %v1337_v27 = vpop.f32.mrf.mxu1  ;;  %v1064_v1 = vpop.xlane.xlu0 %1063 }
 0x36f   :  { %1665 = vst.msk [vmem:[%s3030_s2 + $0x38] sm:$0xff] %vm289_vm1, %v1337_v27  ;;  %2034 = vrcp.f32 %v1064_v1 }
 0x370   :  { %v1157_v40 = vsub.f32 2.0, %v1125_v11  ;;  %2036 = vrcp.f32 %v1067_v39 }
 0x371   :  { %2038 = vrcp.f32 %v1046_v57  ;;  %v1073_v47 = vpop.xlane.xlu1 %1072 }
 0x372   :  { %v1189_v37 = vmul.f32 %v2033_v43, %v1157_v40 }
 0x374   :  { %v1221_v59 = vmul.f32 %v2811_v25, %v1189_v37 }
 0x375   :  { %v2035_v24 = vpop.eup %2034 }
 0x376   :  { %1810 = vmatmul.msk.f32.gmra.mxu1 %vm785_vm3, %v1221_v59  ;;  %v1134_v50 = vmul.f32 %v2035_v24, %v1064_v1  ;;  %v2037_v56 = vpop.eup %2036 }
 0x377   :  { %v2039_v53 = vpop.eup %2038  ;;  %v1135_v25 = vmul.f32 %v2037_v56, %v1067_v39 }
 0x378   :  { %v1166_v21 = vsub.f32 2.0, %v1134_v50  ;;  %v1128_v5 = vmul.f32 %v2039_v53, %v1046_v57 }
 0x379   :  { %v1043_v42 = vpop.xlane.xlu2 %1042  ;;  %v1167_v58 = vsub.f32 2.0, %v1135_v25 }
 0x37a   :  { %2040 = vrcp.f32 %v1043_v42  ;;  %v1198_v41 = vmul.f32 %v2035_v24, %v1166_v21  ;;  %v1160_v6 = vsub.f32 2.0, %v1128_v5 }
 0x37b   :  { %v1381_v30 = vpop.f32.mrf.mxu2  ;;  %2042 = vrcp.f32 %v1070_v35  ;;  %v1199_v49 = vmul.f32 %v2037_v56, %v1167_v58 }
 0x37c   :  { %1666 = vst.msk [vmem:[%s3030_s2 + $0x40] sm:$0xff] %vm289_vm1, %v1381_v30  ;;  %2044 = vrcp.f32 %v1061_v7  ;;  %v1230_v61 = vmul.f32 %v2823_v10, %v1198_v41  ;;  %v1192_v22 = vmul.f32 %v2039_v53, %v1160_v6 }
 0x37e   :  { %v1224_v19 = vmul.f32 %v2799_v54, %v1192_v22 }
 0x380   :  { %v2041_v55 = vpop.eup %2040 }
 0x381   :  { %v1127_v52 = vmul.f32 %v2041_v55, %v1043_v42  ;;  %v1921_v36 = vpop.permute.xlu0 %1920  ;;  %v1058_v8 = vpop.xlane.xlu2 %1057 }
 0x382   :  { %v1922_v46 = vunpack.i.l.bf16 %v1921_v36  ;;  %2046 = vrcp.f32 %v1058_v8  ;;  %v1923_v45 = vunpack.i.h.bf16 %v1921_v36  ;;  %v2043_v44 = vpop.eup %2042 }
 0x383   :  { %v1159_v9 = vsub.f32 2.0, %v1127_v52  ;;  %v1384_v60 = vpop.f32.mrf.mxu2  ;;  %v2045_v13 = vpop.eup %2044  ;;  %2048 = vrcp.f32 %v1073_v47  ;;  %v1136_v51 = vmul.f32 %v2043_v44, %v1070_v35 }
 0x384   :  { %1667 = vst.msk [vmem:[%s3030_s2 + $0x48] sm:$0xff] %vm289_vm1, %v1384_v60  ;;  %1643 = vmatpush.msrb.mxu1 %v1922_v46  ;;  %v1133_v62 = vmul.f32 %v2045_v13, %v1061_v7 }
 0x385   :  { %v1191_v0 = vmul.f32 %v2041_v55, %v1159_v9  ;;  %v1168_v28 = vsub.f32 2.0, %v1136_v51 }
 0x386   :  { %1644 = vmatpush.msrb.mxu1 %v1923_v45  ;;  %v1165_v12 = vsub.f32 2.0, %v1133_v62 }
 0x387   :  { %1819 = vmatmul.msk.f32.vlgmr.msrb.gmra.mxu1 %vm785_vm3, %v1230_v61  ;;  %v1223_v23 = vmul.f32 %v2839_v31, %v1191_v0  ;;  %v1231_v31 = vmul.f32 %v2789_v63, %v1199_v49  ;;  %v1200_v3 = vmul.f32 %v2043_v44, %v1168_v28 }
 0x388   :  { %v2047_v17 = vpop.eup %2046  ;;  %v1197_v39 = vmul.f32 %v2045_v13, %v1165_v12 }
 0x389   :  { %v1132_v14 = vmul.f32 %v2047_v17, %v1058_v8  ;;  %1812 = vmatmul.msk.f32.gmra.mxu2 %vm785_vm3, %v1223_v23  ;;  %v2049_v15 = vpop.eup %2048  ;;  %v1232_v54 = vmul.f32 %v2808_v16, %v1200_v3 }
 0x38a   :  { %v1137_v34 = vmul.f32 %v2049_v15, %v1073_v47 }
 0x38b   :  { %v1164_v10 = vsub.f32 2.0, %v1132_v14  ;;  %v1387_v18 = vpop.f32.mrf.mxu2 }
 0x38c   :  { %1668 = vst.msk [vmem:[%s3030_s2 + $0x50] sm:$0xff] %vm289_vm1, %v1387_v18  ;;  %v1169_v63 = vsub.f32 2.0, %v1137_v34 }
 0x38d   :  { %v1196_v33 = vmul.f32 %v2047_v17, %v1164_v10 }
 0x38e   :  { %v1201_v20 = vmul.f32 %v2049_v15, %v1169_v63 }
 0x38f   :  { %1820 = vmatmul.msk.f32.gmra.mxu1 %vm785_vm3, %v1231_v31  ;;  %v1228_v38 = vmul.f32 %v2845_v4, %v1196_v33  ;;  %v1229_v4 = vmul.f32 %v2819_v2, %v1197_v39 }
 0x390   :  { %v1233_v43 = vmul.f32 %v2831_v26, %v1201_v20 }
 0x391   :  { %1813 = vmatmul.msk.f32.gmra.mxu2 %vm785_vm3, %v1224_v19  ;;  %1817 = vmatmul.msk.f32.gmra.mxu3 %vm785_vm3, %v1228_v38 }
 0x393   :  { %v1390_v29 = vpop.f32.mrf.mxu2  ;;  %v1434_v32 = vpop.f32.mrf.mxu3 }
 0x394   :  { %1669 = vst.msk [vmem:[%s3030_s2 + $0x58] sm:$0xff] %vm289_vm1, %v1390_v29 }
 0x395   :  { %1670 = vst.msk [vmem:[%s3030_s2 + $0x60] sm:$0xff] %vm289_vm1, %v1434_v32 }
 0x397   :  { %1821 = vmatmul.msk.f32.gmra.mxu1 %vm785_vm3, %v1232_v54 }
 0x399   :  { %1818 = vmatmul.msk.f32.gmra.mxu3 %vm785_vm3, %v1229_v4 }
 0x39b   :  { %v1437_v57 = vpop.f32.mrf.mxu3 }
 0x39c   :  { %1671 = vst.msk [vmem:[%s3030_s2 + $0x68] sm:$0xff] %vm289_vm1, %v1437_v57 }
 0x39f   :  { %1822 = vmatmul.msk.f32.gmra.mxu1 %vm785_vm3, %v1233_v43 }
 0x3a3   :  { %v1440_v11 = vpop.f32.mrf.mxu3 }
 0x3a4   :  { %1672 = vst.msk [vmem:[%s3030_s2 + $0x70] sm:$0xff] %vm289_vm1, %v1440_v11 }
 0x3ab   :  { %v1443_v16 = vpop.f32.mrf.mxu3 }
 0x3ac   :  { %1673 = vst.msk [vmem:[%s3030_s2 + $0x78] sm:$0xff] %vm289_vm1, %v1443_v16  ;;  %v1049_v2 = vpop.xlane.xlu0 %1048 }
 0x3ad   :  { %2050 = vrcp.f32 %v1049_v2 }
 0x3b3   :  { %v2051_v27 = vpop.eup %2050 }
 0x3b4   :  { %v1129_v1 = vmul.f32 %v2051_v27, %v1049_v2 }
 0x3b6   :  { %v1161_v40 = vsub.f32 2.0, %v1129_v1  ;;  %v1487_v26 = vpop.f32.mrf.mxu1 }
 0x3b7   :  { %1674 = vst.msk [vmem:[%s3030_s2 + $0x80] sm:$0xff] %vm289_vm1, %v1487_v26 }
 0x3b8   :  { %v1193_v35 = vmul.f32 %v2051_v27, %v1161_v40 }
 0x3ba   :  { %v1225_v37 = vmul.f32 %v2868_v48, %v1193_v35 }
 0x3bc   :  { %1814 = vmatmul.msk.f32.gmra.mxu2 %vm785_vm3, %v1225_v37 }
 0x3be   :  { %v1490_v59 = vpop.f32.mrf.mxu1 }
 0x3bf   :  { %1675 = vst.msk [vmem:[%s3030_s2 + $0x88] sm:$0xff] %vm289_vm1, %v1490_v59 }
 0x3c6   :  { %v1493_v24 = vpop.f32.mrf.mxu1 }
 0x3c7   :  { %1676 = vst.msk [vmem:[%s3030_s2 + $0x90] sm:$0xff] %vm289_vm1, %v1493_v24  ;;  %v1593_v50 = vpop.f32.mrf.mxu3 }
 0x3c8   :  { %1682 = vst.msk [vmem:[%s3030_s2 + $0xc0] sm:$0xff] %vm289_vm1, %v1593_v50 }
 0x3cf   :  { %v1596_v48 = vpop.f32.mrf.mxu3 }
 0x3d0   :  { %1683 = vst.msk [vmem:[%s3030_s2 + $0xc8] sm:$0xff] %vm289_vm1, %v1596_v48 }
 0x3d4   :  { %v1540_v42 = vpop.f32.mrf.mxu2 }
 0x3d5   :  { %1678 = vst.msk [vmem:[%s3030_s2 + $0xa0] sm:$0xff] %vm289_vm1, %v1540_v42 }
 0x3f3   :  { %v1496_v7 = vpop.f32.mrf.mxu1 }
 0x3f4   :  { %1677 = vst.msk [vmem:[%s3030_s2 + $0x98] sm:$0xff] %vm289_vm1, %v1496_v7 }
 0x404   :  { %v1646_v30 = vpop.f32.mrf.mxu1 }
 0x405   :  { %1686 = vst.msk [vmem:[%s3030_s2 + $0xe0] sm:$0xff] %vm289_vm1, %v1646_v30 }
 0x40c   :  { %v1543_v21 = vpop.f32.mrf.mxu2  ;;  %v1649_v56 = vpop.f32.mrf.mxu1 }
 0x40d   :  { %1679 = vst.msk [vmem:[%s3030_s2 + $0xa8] sm:$0xff] %vm289_vm1, %v1543_v21 }
 0x40e   :  { %1687 = vst.msk [vmem:[%s3030_s2 + $0xe8] sm:$0xff] %vm289_vm1, %v1649_v56 }
 0x414   :  { %v1546_v53 = vpop.f32.mrf.mxu2  ;;  %v1599_v55 = vpop.f32.mrf.mxu3 }
 0x415   :  { %1680 = vst.msk [vmem:[%s3030_s2 + $0xb0] sm:$0xff] %vm289_vm1, %v1546_v53  ;;  %v1652_v25 = vpop.f32.mrf.mxu1 }
 0x416   :  { %1684 = vst.msk [vmem:[%s3030_s2 + $0xd0] sm:$0xff] %vm289_vm1, %v1599_v55 }
 0x417   :  { %1688 = vst.msk [vmem:[%s3030_s2 + $0xf0] sm:$0xff] %vm289_vm1, %v1652_v25 }
 0x41c   :  { %v1602_v41 = vpop.f32.mrf.mxu3 }
 0x41d   :  { %1685 = vst.msk [vmem:[%s3030_s2 + $0xd8] sm:$0xff] %vm289_vm1, %v1602_v41  ;;  %v1655_v52 = vpop.f32.mrf.mxu1 }
 0x41e   :  { %1689 = vst.msk [vmem:[%s3030_s2 + $0xf8] sm:$0xff] %vm289_vm1, %v1655_v52 }
 0x43f   :  { %v1549_v36 = vpop.f32.mrf.mxu2 }
 0x440   :  { %1681 = vst.msk [vmem:[%s3030_s2 + $0xb8] sm:$0xff] %vm289_vm1, %v1549_v36 }
 0x441   :  { %1694 = vsyncpa [#allocation3], 1 }

</bundles_post_ra>
